<compile_context>
chip_gen: v7x
topology: tpu7x:2x2x1
jax: 0.10.0
libtpu: 0.0.40
codegen_flags: <defaults>
</compile_context>

<pallas_src>
from functools import partial

import numpy as np

import jax
import jax.numpy as jnp
from jax.experimental import pallas as pl
from jax.experimental.pallas import tpu as pltpu


_VMEM = pl.BlockSpec(memory_space=pltpu.MemorySpace.VMEM)


# ------------------------------ fused kernel --------------------------------

def _fused_forward_kernel(x_ref, d1_ref, c1b_ref, p1_ref, d2_ref, c2b_ref,
                          w1f_ref, fb1_ref, w2p_ref, fb2p_ref, o_ref):
    """Entire SimpleCNN forward; activations never leave VMEM.

    Stage chain (shapes for B=2, img_dim=16, n_kernels=4, n_hidden=32):
      x (2,256)bf16 @ D1 (256,1024)bf16 + b1 -> ReLU   conv1 (16x16 kept outs)
                    @ P1 (1024,256)bf16               avg-pool 2x2
                    @ D2 (256,512)bf16  + b2 -> ReLU   conv2 (8x8 kept outs)
                    @ W1f(512,32)bf16   + fb1 -> ReLU  pool2 @ fc1 (fused)
                    @ W2p(32,128)bf16   + fb2          fc2, zero-padded to 128
    Accumulation is f32 (preferred_element_type); bias + ReLU in f32.
    """
    f32, bf16 = jnp.float32, jnp.bfloat16

    # conv1 (+bias, ReLU) on the 16x16 outputs the floor-mode pool consumes.
    h = jnp.dot(x_ref[...], d1_ref[...], preferred_element_type=f32)
    h = jnp.maximum(h + c1b_ref[...], 0.0)

    # avg-pool 2x2
    h = jnp.dot(h.astype(bf16), p1_ref[...], preferred_element_type=f32)

    # conv2 (+bias, ReLU) on the 8x8 outputs the second pool consumes.
    h = jnp.dot(h, d2_ref[...], preferred_element_type=f32)
    h = jnp.maximum(h + c2b_ref[...], 0.0)

    # fused (avg-pool 2x2 -> flatten -> fc1), then bias + ReLU in f32.
    h = jnp.dot(h.astype(bf16), w1f_ref[...], preferred_element_type=f32)
    h = jnp.maximum(h + fb1_ref[...], 0.0)

    # fc2, zero-padded to a lane-dense 128-wide output tile.
    h = jnp.dot(h.astype(bf16), w2p_ref[...], preferred_element_type=f32)
    o_ref[...] = (h + fb2p_ref[...]).astype(o_ref.dtype)


# --------------------- one-time parameter lowering (init) -------------------

def _conv2x2_p1_as_matrix(w, H, W, keep_h, keep_w):
    """Dense operator D for Conv2d(kernel=2, stride=1, padding=1), NCHW order.

    vec_nchw(x) @ D == vec_nchw(conv(x, w)[:, :, :keep_h, :keep_w])   (no bias)
    D has shape (Cin*H*W, Cout*keep_h*keep_w).  Built once at init time.
    """
    Cout, Cin, kh, kw = w.shape
    pad = 1
    co, oy, ox, ci, dy, dx = np.meshgrid(
        np.arange(Cout), np.arange(keep_h), np.arange(keep_w),
        np.arange(Cin), np.arange(kh), np.arange(kw), indexing="ij")
    iy, ix = oy + dy - pad, ox + dx - pad
    valid = (iy >= 0) & (iy < H) & (ix >= 0) & (ix < W)
    rows = np.where(valid,
                    (ci * H + np.clip(iy, 0, H - 1)) * W + np.clip(ix, 0, W - 1),
                    0).ravel()
    cols = ((co * keep_h + oy) * keep_w + ox).ravel()
    vals = w[co.ravel(), ci.ravel(), dy.ravel(), dx.ravel()].astype(jnp.float32)
    vals = jnp.where(jnp.asarray(valid.ravel()), vals, 0.0)
    D = jnp.zeros((Cin * H * W, Cout * keep_h * keep_w), jnp.float32)
    return D.at[rows, cols].add(vals)     # .add: zeroed "padding" taps are inert


def _avgpool2x2_as_matrix(C, H, W):
    """Dense operator P (C*H*W, C*(H//2)*(W//2)) for nn.AvgPool2d(2, 2); H, W even."""
    Ho, Wo = H // 2, W // 2
    c, h, w, dy, dx = np.meshgrid(np.arange(C), np.arange(Ho), np.arange(Wo),
                                  np.arange(2), np.arange(2), indexing="ij")
    rows = ((c * H + 2 * h + dy) * W + 2 * w + dx).ravel()
    cols = ((c * Ho + h) * Wo + w).ravel()
    P = np.zeros((C * H * W, C * Ho * Wo), np.float32)
    P[rows, cols] = 0.25
    return jnp.asarray(P)


def init_params(key, img_dim, n_categories, n_hidden, n_kernels):
    """PyTorch-layout parameters (Conv2d OIHW weights, Linear (out,in) weights)."""
    ks = jax.random.split(key, 8)
    feat = 2 * n_kernels * (img_dim // 4) * (img_dim // 4)
    scale = 0.1
    return {
        "w1": scale * jax.random.normal(ks[0], (n_kernels, 1, 2, 2), jnp.float32),
        "b1": scale * jax.random.normal(ks[1], (n_kernels,), jnp.float32),
        "w2": scale * jax.random.normal(ks[2], (2 * n_kernels, n_kernels, 2, 2), jnp.float32),
        "b2": scale * jax.random.normal(ks[3], (2 * n_kernels,), jnp.float32),
        "fw1": scale * jax.random.normal(ks[4], (n_hidden, feat), jnp.float32),
        "fb1": scale * jax.random.normal(ks[5], (n_hidden,), jnp.float32),
        "fw2": scale * jax.random.normal(ks[6], (n_categories - 1, n_hidden), jnp.float32),
        "fb2": scale * jax.random.normal(ks[7], (n_categories - 1,), jnp.float32),
    }


def prepare_params(params, img_dim, n_kernels, pad_out=128):
    """Hoist ALL weight layout work out of the forward path (done once).

    Lowers conv1/conv2/pool1 to dense NCHW-flattened bf16 operators (only the
    conv outputs that the floor-mode pool consumes are kept), fuses pool2 with
    fc1 into one (512, n_hidden) operator, pre-broadcasts the conv biases, and
    zero-pads fc2 to a lane-dense 128-wide output.
    """
    C1, C2 = n_kernels, 2 * n_kernels
    s0 = img_dim                      # conv1 input spatial
    k1 = ((s0 + 1) // 2) * 2          # conv1 outputs kept by pool1 (floor mode)
    s1 = k1 // 2                      # pool1 output spatial
    k2 = ((s1 + 1) // 2) * 2          # conv2 outputs kept by pool2
    s2 = k2 // 2                      # pool2 output spatial
    assert params["fw1"].shape[1] == C2 * s2 * s2

    bf16 = jnp.bfloat16
    D1 = _conv2x2_p1_as_matrix(params["w1"], s0, s0, k1, k1)       # (256, 1024)
    P1 = _avgpool2x2_as_matrix(C1, k1, k1)                         # (1024, 256)
    D2 = _conv2x2_p1_as_matrix(params["w2"], s1, s1, k2, k2)       # (256, 512)
    P2 = _avgpool2x2_as_matrix(C2, k2, k2)                         # (512, 128)
    # Fuse pool2 with fc1 (no nonlinearity in between): (512, n_hidden).
    W1f = P2 @ params["fw1"].T.astype(jnp.float32)
    # Zero-pad fc2 to a lane-dense 128-wide output tile.
    n_out, n_hidden = params["fw2"].shape
    W2p = jnp.zeros((n_hidden, pad_out), jnp.float32).at[:, :n_out].set(
        params["fw2"].T.astype(jnp.float32))
    fb2p = jnp.zeros((1, pad_out), jnp.float32).at[0, :n_out].set(
        params["fb2"].astype(jnp.float32))

    # TODO(synk): on v5e, optionally stream the late-stage weights via manual
    # make_async_copy under the D1 matmul and/or quantize D1/P1/D2 to int8.
    return {
        "D1": D1.astype(bf16),
        "c1b": jnp.repeat(params["b1"].astype(jnp.float32), k1 * k1)[None, :],
        "P1": P1.astype(bf16),
        "D2": D2.astype(bf16),
        "c2b": jnp.repeat(params["b2"].astype(jnp.float32), k2 * k2)[None, :],
        "W1f": W1f.astype(bf16),
        "fb1": params["fb1"].astype(jnp.float32)[None, :],
        "W2p": W2p.astype(bf16),
        "fb2p": fb2p,
    }


# ------------------------------ forward pass --------------------------------

@partial(jax.jit, static_argnames=("n_out",))
def simple_cnn_forward(x, prepped, n_out):
    """x: (B, 1, img_dim, img_dim) NCHW -> logits (B, n_out).

    Single fused Pallas call; all operands resident in VMEM (~1.3 MiB bf16).
    The kernel writes a lane-dense (B, 128) tile; the real logits are the
    first n_out columns.
    """
    B = x.shape[0]
    x2d = x.reshape(B, -1).astype(jnp.bfloat16)        # NCHW flatten of the input
    pad_out = prepped["W2p"].shape[1]
    logits_pad = pl.pallas_call(
        _fused_forward_kernel,
        out_shape=jax.ShapeDtypeStruct((B, pad_out), jnp.float32),
        in_specs=[_VMEM] * 10,
        out_specs=_VMEM,
    )(x2d, prepped["D1"], prepped["c1b"], prepped["P1"],
      prepped["D2"], prepped["c2b"], prepped["W1f"], prepped["fb1"],
      prepped["W2p"], prepped["fb2p"])
    return logits_pad[:, :n_out]


# --------------------- pure-JAX reference (correctness) ---------------------

def _reference_forward(x, params):
    def conv(x, w, b):
        y = jax.lax.conv_general_dilated(
            x, w, window_strides=(1, 1), padding=((1, 1), (1, 1)),
            dimension_numbers=("NCHW", "OIHW", "NCHW"))
        return jnp.maximum(y + b[None, :, None, None], 0.0)

    def pool(x):
        Ho, Wo = x.shape[2] // 2, x.shape[3] // 2
        xc = x[:, :, : 2 * Ho, : 2 * Wo]
        return 0.25 * (xc[:, :, 0::2, 0::2] + xc[:, :, 0::2, 1::2]
                       + xc[:, :, 1::2, 0::2] + xc[:, :, 1::2, 1::2])

    h = pool(conv(x, params["w1"], params["b1"]))
    h = pool(conv(h, params["w2"], params["b2"]))
    h = h.reshape(x.shape[0], -1)
    h = jnp.maximum(h @ params["fw1"].T + params["fb1"], 0.0)
    return h @ params["fw2"].T + params["fb2"]


if __name__ == "__main__":
    IMG_DIM, N_CAT, N_HIDDEN, N_KERNELS, BATCH = 16, 8, 32, 4, 2

    key = jax.random.PRNGKey(0)
    k_x, k_p = jax.random.split(key)
    x = jax.random.normal(k_x, (BATCH, 1, IMG_DIM, IMG_DIM), jnp.float32)
    params = init_params(k_p, IMG_DIM, N_CAT, N_HIDDEN, N_KERNELS)
    prepped = prepare_params(params, IMG_DIM, N_KERNELS)   # one-time weight prep

    out = simple_cnn_forward(x, prepped, n_out=N_CAT - 1)
    out = jax.block_until_ready(out)
    assert out.shape == (BATCH, N_CAT - 1), out.shape

    # Tolerance covers bf16 weight/activation storage + TPU MXU default
    # precision vs. the XLA f32 reference; any structural bug shows up as
    # O(0.1) error on O(0.1) logits.
    ref = jax.block_until_ready(_reference_forward(x, params))
    assert jnp.allclose(out, ref, atol=3e-2, rtol=3e-2), "mismatch vs reference"

    print("KERNEL_OK")
</pallas_src>

<mosaic_0001>
module attributes {stable_mosaic.version = 11 : i64} {
  func.func @_fused_forward_kernel(%arg0: memref<2x256xbf16, #tpu.memory_space<vmem>>, %arg1: memref<256x1024xbf16, #tpu.memory_space<vmem>>, %arg2: memref<1x1024xf32, #tpu.memory_space<vmem>>, %arg3: memref<1024x256xbf16, #tpu.memory_space<vmem>>, %arg4: memref<256x512xbf16, #tpu.memory_space<vmem>>, %arg5: memref<1x512xf32, #tpu.memory_space<vmem>>, %arg6: memref<512x32xbf16, #tpu.memory_space<vmem>>, %arg7: memref<1x32xf32, #tpu.memory_space<vmem>>, %arg8: memref<32x128xbf16, #tpu.memory_space<vmem>>, %arg9: memref<1x128xf32, #tpu.memory_space<vmem>>, %arg10: memref<2x128xf32, #tpu.memory_space<vmem>>) attributes {dimension_semantics = [], scalar_prefetch = 0 : i64, scratch_operands = 0 : i64, tpu.core_type = #tpu.core_type<tc>} {
    %c0 = arith.constant 0 : index
    %c0_0 = arith.constant 0 : index
    %0 = vector.load %arg0[%c0, %c0_0] : memref<2x256xbf16, #tpu.memory_space<vmem>>, vector<2x256xbf16>
    %c0_1 = arith.constant 0 : index
    %c0_2 = arith.constant 0 : index
    %1 = vector.load %arg1[%c0_1, %c0_2] : memref<256x1024xbf16, #tpu.memory_space<vmem>>, vector<256x1024xbf16>
    %cst = arith.constant dense<0.000000e+00> : vector<2x1024xf32>
    %2 = tpu.matmul %0, %1, %cst {dimension_numbers = #tpu.dot_dimension_numbers<[1], [0], [0], [1], [0, 0, 1, 1], [], []>} : vector<2x256xbf16>, vector<256x1024xbf16>, vector<2x1024xf32> -> vector<2x1024xf32>
    %c0_3 = arith.constant 0 : index
    %c0_4 = arith.constant 0 : index
    %3 = vector.load %arg2[%c0_3, %c0_4] : memref<1x1024xf32, #tpu.memory_space<vmem>>, vector<1x1024xf32>
    %4 = vector.broadcast %3 : vector<1x1024xf32> to vector<2x1024xf32>
    %5 = arith.addf %2, %4 : vector<2x1024xf32>
    %cst_5 = arith.constant 0.000000e+00 : f32
    %6 = vector.broadcast %cst_5 : f32 to vector<2x1024xf32>
    %7 = arith.maximumf %5, %6 : vector<2x1024xf32>
    %8 = arith.truncf %7 : vector<2x1024xf32> to vector<2x1024xbf16>
    %c0_6 = arith.constant 0 : index
    %c0_7 = arith.constant 0 : index
    %9 = vector.load %arg3[%c0_6, %c0_7] : memref<1024x256xbf16, #tpu.memory_space<vmem>>, vector<1024x256xbf16>
    %cst_8 = arith.constant dense<0.000000e+00> : vector<2x256xf32>
    %10 = tpu.matmul %8, %9, %cst_8 {dimension_numbers = #tpu.dot_dimension_numbers<[1], [0], [0], [1], [0, 0, 1, 1], [], []>} : vector<2x1024xbf16>, vector<1024x256xbf16>, vector<2x256xf32> -> vector<2x256xf32>
    %c0_9 = arith.constant 0 : index
    %c0_10 = arith.constant 0 : index
    %11 = vector.load %arg4[%c0_9, %c0_10] : memref<256x512xbf16, #tpu.memory_space<vmem>>, vector<256x512xbf16>
    %cst_11 = arith.constant dense<0.000000e+00> : vector<2x512xf32>
    %12 = tpu.matmul %10, %11, %cst_11 {dimension_numbers = #tpu.dot_dimension_numbers<[1], [0], [0], [1], [0, 0, 1, 1], [], []>} : vector<2x256xf32>, vector<256x512xbf16>, vector<2x512xf32> -> vector<2x512xf32>
    %c0_12 = arith.constant 0 : index
    %c0_13 = arith.constant 0 : index
    %13 = vector.load %arg5[%c0_12, %c0_13] : memref<1x512xf32, #tpu.memory_space<vmem>>, vector<1x512xf32>
    %14 = vector.broadcast %13 : vector<1x512xf32> to vector<2x512xf32>
    %15 = arith.addf %12, %14 : vector<2x512xf32>
    %cst_14 = arith.constant 0.000000e+00 : f32
    %16 = vector.broadcast %cst_14 : f32 to vector<2x512xf32>
    %17 = arith.maximumf %15, %16 : vector<2x512xf32>
    %18 = arith.truncf %17 : vector<2x512xf32> to vector<2x512xbf16>
    %c0_15 = arith.constant 0 : index
    %c0_16 = arith.constant 0 : index
    %19 = vector.load %arg6[%c0_15, %c0_16] : memref<512x32xbf16, #tpu.memory_space<vmem>>, vector<512x32xbf16>
    %cst_17 = arith.constant dense<0.000000e+00> : vector<2x32xf32>
    %20 = tpu.matmul %18, %19, %cst_17 {dimension_numbers = #tpu.dot_dimension_numbers<[1], [0], [0], [1], [0, 0, 1, 1], [], []>} : vector<2x512xbf16>, vector<512x32xbf16>, vector<2x32xf32> -> vector<2x32xf32>
    %c0_18 = arith.constant 0 : index
    %c0_19 = arith.constant 0 : index
    %21 = vector.load %arg7[%c0_18, %c0_19] : memref<1x32xf32, #tpu.memory_space<vmem>>, vector<1x32xf32>
    %22 = vector.broadcast %21 : vector<1x32xf32> to vector<2x32xf32>
    %23 = arith.addf %20, %22 : vector<2x32xf32>
    %cst_20 = arith.constant 0.000000e+00 : f32
    %24 = vector.broadcast %cst_20 : f32 to vector<2x32xf32>
    %25 = arith.maximumf %23, %24 : vector<2x32xf32>
    %26 = arith.truncf %25 : vector<2x32xf32> to vector<2x32xbf16>
    %c0_21 = arith.constant 0 : index
    %c0_22 = arith.constant 0 : index
    %27 = vector.load %arg8[%c0_21, %c0_22] : memref<32x128xbf16, #tpu.memory_space<vmem>>, vector<32x128xbf16>
    %cst_23 = arith.constant dense<0.000000e+00> : vector<2x128xf32>
    %28 = tpu.matmul %26, %27, %cst_23 {dimension_numbers = #tpu.dot_dimension_numbers<[1], [0], [0], [1], [0, 0, 1, 1], [], []>} : vector<2x32xbf16>, vector<32x128xbf16>, vector<2x128xf32> -> vector<2x128xf32>
    %c0_24 = arith.constant 0 : index
    %c0_25 = arith.constant 0 : index
    %29 = vector.load %arg9[%c0_24, %c0_25] : memref<1x128xf32, #tpu.memory_space<vmem>>, vector<1x128xf32>
    %30 = vector.broadcast %29 : vector<1x128xf32> to vector<2x128xf32>
    %31 = arith.addf %28, %30 : vector<2x128xf32>
    %c0_26 = arith.constant 0 : index
    %c0_27 = arith.constant 0 : index
    %32 = vector.load %arg10[%c0_26, %c0_27] : memref<2x128xf32, #tpu.memory_space<vmem>>, vector<2x128xf32>
    tpu.vector_store %arg10[%c0_26, %c0_27], %31 {strides = array<i32>} : memref<2x128xf32, #tpu.memory_space<vmem>>, vector<2x128xf32>,
    return
  }
}

</mosaic_0001>

<bundles_post_ra>
// kernel: simple_cnn_forward.1
= control target key start
LH: loop header
LB: loop body
LE: loop exit
PB: predicated region body
PF: predicated region fallthrough
CT: control target
= control target key end

     0   :  { %15 = vsyncpa [#allocation3], 0  ;;  %s4105_s0 = inlined_call_operand.vmem [shape: bf16[2,256], index: 0, kind: input, shape index: {}]   ;;  %s4106_s1 = inlined_call_operand.hbm [shape: bf16[256,1024], index: 1, kind: input, shape index: {}]   ;;  %s4107_s2 = inlined_call_operand.vmem [shape: f32[1,1024], index: 2, kind: input, shape index: {}]   ;;  %s4108_s3 = inlined_call_operand.hbm [shape: bf16[1024,256], index: 3, kind: input, shape index: {}]   ;;  %s4109_s4 = inlined_call_operand.hbm [shape: bf16[256,512], index: 4, kind: input, shape index: {}]   ;;  %s4110_s5 = inlined_call_operand.vmem [shape: f32[1,512], index: 5, kind: input, shape index: {}]   ;;  %s4111_s6 = inlined_call_operand.vmem [shape: bf16[512,32], index: 6, kind: input, shape index: {}]   ;;  %s4112_s7 = inlined_call_operand.vmem [shape: f32[1,32], index: 7, kind: input, shape index: {}]   ;;  %s4113_s8 = inlined_call_operand.vmem [shape: bf16[32,128], index: 8, kind: input, shape index: {}]   ;;  %s4114_s9 = inlined_call_operand.vmem [shape: f32[1,128], index: 9, kind: input, shape index: {}]   ;;  %s4115_s10 = inlined_call_operand.hbm [shape: f32[2,128], index: 10, kind: output, shape index: {}]  }
   0x1   :  { %16 = vsyncpa [#allocation6], 0 }
   0x2   :  { %17 = vsyncpa [#allocation4], 0  ;;  %s3801_s13 = smov [#allocation5]   ;;  %s3707_s17 = scalar_lea.hbm %s4108_s3, 16384 }
   0x3   :  { %s39_s14 = sshll.u32 %s3801_s13, 4  ;;  %p3708_p0 = scmp.ne.s32.totalorder %s4108_s3, %s3707_s17  ;;  %s40_s14 = int_to_ptr.vmem [resolvable:$true] %s39_s14 }
   0x4   :  { %p3711_p1 = scmp.lt.u32.totalorder %s3707_s17, %s4108_s3 }
   0x6   :  { %p3713_p2 = pnand %p3711_p1, %p3708_p0 }
   0x8   :  { %3716 = shalt.err (!%p3713_p2)
}
   0x9   :  { %s3717_s22 = scalar_lea.vmem %s40_s14, 16384  ;;  %p3722_p4 = scmp.lt.s32.totalorder %s40_s14, %s40_s14 }
   0xa   :  { %p3718_p3 = scmp.ne.s32.totalorder %s40_s14, %s3717_s22  ;;  %p3723_p5 = scmp.lt.s32.totalorder %s3717_s22, %s3717_s22 }
   0xc   :  { %p3724_p6 = por %p3723_p5, %p3722_p4 }
   0xe   :  { %p3725_p7 = pnand %p3724_p6, %p3718_p3 }
  0x10   :  { %3728 = shalt.err (!%p3725_p7)
}
  0x11   :  { %s3802_s23 = smov 128   ;;  %s3803_s24 = smov 8  }
  0x12   :  { %45 = dma.hbm_to_vmem [thread:$0]  %s4108_s3, 16384, %s40_s14, [#allocation6], %s3802_s23, %s3802_s23, %s3803_s24  }
  0x13   :  { %s3804_s27 = smov [#allocation2]   ;;  %s3729_s11 = scalar_lea.hbm %s4106_s1, 16384 }
  0x14   :  { %s25_s28 = sshll.u32 %s3804_s27, 4  ;;  %p3730_p8 = scmp.ne.s32.totalorder %s4106_s1, %s3729_s11  ;;  %s26_s28 = int_to_ptr.vmem [resolvable:$true] %s25_s28 }
  0x15   :  { %p3733_p9 = scmp.lt.u32.totalorder %s3729_s11, %s4106_s1 }
  0x17   :  { %p3735_p10 = pnand %p3733_p9, %p3730_p8 }
  0x19   :  { %3738 = shalt.err (!%p3735_p10)
}
  0x1a   :  { %s3739_s17 = scalar_lea.vmem %s26_s28, 16384  ;;  %p3744_p12 = scmp.lt.s32.totalorder %s26_s28, %s26_s28 }
  0x1b   :  { %p3740_p11 = scmp.ne.s32.totalorder %s26_s28, %s3739_s17  ;;  %p3745_p13 = scmp.lt.s32.totalorder %s3739_s17, %s3739_s17 }
  0x1d   :  { %p3746_p0 = por %p3745_p13, %p3744_p12 }
  0x1f   :  { %p3747_p1 = pnand %p3746_p0, %p3740_p11 }
  0x21   :  { %3750 = shalt.err (!%p3747_p1)
}
  0x22   :  { %s3805_s3 = smov 512   ;;  %s3806_s14 = smov 32  }
  0x23   :  { %31 = dma.hbm_to_vmem [thread:$0]  %s4106_s1, 16384, %s26_s28, [#allocation3], %s3805_s3, %s3805_s3, %s3806_s14  }
  0x24   :  { %s3807_s20 = smov [#allocation7]   ;;  %s3751_s24 = scalar_lea.hbm %s4109_s4, 8192 }
  0x25   :  { %s51_s21 = sshll.u32 %s3807_s20, 4  ;;  %p3752_p2 = scmp.ne.s32.totalorder %s4109_s4, %s3751_s24  ;;  %s52_s21 = int_to_ptr.vmem [resolvable:$true] %s51_s21 }
  0x26   :  { %p3755_p3 = scmp.lt.u32.totalorder %s3751_s24, %s4109_s4 }
  0x28   :  { %p3757_p4 = pnand %p3755_p3, %p3752_p2 }
  0x2a   :  { %3760 = shalt.err (!%p3757_p4)
}
  0x2b   :  { %s3761_s30 = scalar_lea.vmem %s52_s21, 8192  ;;  %p3766_p6 = scmp.lt.s32.totalorder %s52_s21, %s52_s21 }
  0x2c   :  { %p3762_p5 = scmp.ne.s32.totalorder %s52_s21, %s3761_s30  ;;  %p3767_p7 = scmp.lt.s32.totalorder %s3761_s30, %s3761_s30 }
  0x2e   :  { %p3768_p8 = por %p3767_p7, %p3766_p6 }
  0x30   :  { %p3769_p9 = pnand %p3768_p8, %p3762_p5 }
  0x32   :  { %3772 = shalt.err (!%p3769_p9)
}
  0x33   :  { %s3808_s1 = smov 256   ;;  %s3809_s28 = smov 16  }
  0x34   :  { %57 = dma.hbm_to_vmem [thread:$0]  %s4109_s4, 8192, %s52_s21, [#allocation6], %s3808_s1, %s3808_s1, %s3809_s28  }
  0x35   :  { %3795 = dma.done.wait [#allocation3], 16384  }
  0x36   :  { %3796 = vsyncadd [#allocation3], 4294950912 }
  0x37   :  { %3797 = dma.done.wait [#allocation6], 24576  }
  0x38   :  { %3798 = vsyncadd [#allocation6], 4294942720  ;;  %v79_v0 = vld [vmem:[#allocation2] sm:$0xff]  ;;  %v209_v9 = vlaneseq  ;;  %v3810_v10 = vmov 1966171168   ;;  %v80_v22 = vld [vmem:[#allocation2 + $0x8] sm:$0xff] }
  0x39   :  { %v83_v1 = vld [vmem:[#allocation2 + $0x20] sm:$0xff]  ;;  %v259_v11 = vunpack.c.l.s4 %v3810_v10  ;;  %v84_v24 = vld [vmem:[#allocation2 + $0x28] sm:$0xff]  ;;  %vm3812_vm0 = vmmov 0   ;;  %vm2886_vm1 = vcmask 261120   ;;  %s3813_s12 = smov [#allocation8]  }
  0x3a   :  { %v87_v2 = vld [vmem:[#allocation2 + $0x40] sm:$0xff]  ;;  %v2949_v3 = vcombine.high %v79_v0, %v83_v1  ;;  %v2948_v4 = vcombine.low %v79_v0, %v83_v1  ;;  %v3905_v16 = vshrl.u32 %v209_v9, 7  ;;  %v88_v26 = vld [vmem:[#allocation2 + $0x48] sm:$0xff]  ;;  %v2951_v28 = vcombine.high %v80_v22, %v84_v24  ;;  %s2937_s4 = sshll.u32 %s3813_s12, 4  ;;  %s2938_s4 = int_to_ptr.vmem [resolvable:$true] %s2937_s4 }
  0x3b   :  { %v91_v5 = vld [vmem:[#allocation2 + $0x60] sm:$0xff]  ;;  %v260_v17 = vunpack.c.0.s8 %v259_v11  ;;  %v2950_v29 = vcombine.low %v80_v22, %v84_v24  ;;  %v92_v31 = vld [vmem:[#allocation2 + $0x68] sm:$0xff]  ;;  %p3778_p11 = scmp.lt.s32.totalorder %s2938_s4, %s2938_s4 }
  0x3c   :  { %v2957_v6 = vcombine.high %v87_v2, %v91_v5  ;;  %v95_v7 = vld [vmem:[#allocation2 + $0x80] sm:$0xff]  ;;  %914 = vmatprep.subr.bf16.mxu0 %v2949_v3  ;;  %v2956_v12 = vcombine.low %v87_v2, %v91_v5  ;;  %v2959_v33 = vcombine.high %v88_v26, %v92_v31  ;;  %v96_v34 = vld [vmem:[#allocation2 + $0x88] sm:$0xff]  ;;  %955 = vmatprep.subr.bf16.mxu1 %v2951_v28 }
  0x3d   :  { %v99_v8 = vld [vmem:[#allocation2 + $0xa0] sm:$0xff]  ;;  %915 = vmatpush1.bf16.msra.mxu0 %v2948_v4  ;;  %v3908_v23 = vsub.s32 %v260_v17, %v3905_v16  ;;  %v100_v35 = vld [vmem:[#allocation2 + $0xa8] sm:$0xff]  ;;  %956 = vmatpush1.bf16.msra.mxu1 %v2950_v29  ;;  %v2958_v39 = vcombine.low %v88_v26, %v92_v31 }
  0x3e   :  { %916 = vmatprep.subr.bf16.mxu0 %v2957_v6  ;;  %v2965_v13 = vcombine.high %v95_v7, %v99_v8  ;;  %v103_v14 = vld [vmem:[#allocation2 + $0xc0] sm:$0xff]  ;;  %v2964_v18 = vcombine.low %v95_v7, %v99_v8  ;;  %v2967_v41 = vcombine.high %v96_v34, %v100_v35  ;;  %957 = vmatprep.subr.bf16.mxu1 %v2959_v33  ;;  %v104_v43 = vld [vmem:[#allocation2 + $0xc8] sm:$0xff] }
  0x3f   :  { %v107_v15 = vld [vmem:[#allocation2 + $0xe0] sm:$0xff]  ;;  %v108_v44 = vld [vmem:[#allocation2 + $0xe8] sm:$0xff]  ;;  %v2966_v47 = vcombine.low %v96_v34, %v100_v35 }
  0x40   :  { %v2973_v19 = vcombine.high %v103_v14, %v107_v15  ;;  %v111_v20 = vld [vmem:[#allocation2 + $0x100] sm:$0xff]  ;;  %v2972_v27 = vcombine.low %v103_v14, %v107_v15  ;;  %v2975_v49 = vcombine.high %v104_v43, %v108_v44  ;;  %v112_v51 = vld [vmem:[#allocation2 + $0x108] sm:$0xff]  ;;  %v2974_v55 = vcombine.low %v104_v43, %v108_v44 }
  0x41   :  { %917 = vmatpush1.bf16.msra.mxu0 %v2956_v12  ;;  %v115_v21 = vld [vmem:[#allocation2 + $0x120] sm:$0xff]  ;;  %958 = vmatpush1.bf16.msra.mxu1 %v2958_v39  ;;  %v116_v52 = vld [vmem:[#allocation2 + $0x128] sm:$0xff] }
  0x42   :  { %918 = vmatprep.subr.bf16.mxu0 %v2965_v13  ;;  %v3913_v25 = vld.sshfl [vmem:[%s4105_s0] sm:$0x11 pattern:$0x75316420]  ;;  %v2981_v32 = vcombine.high %v111_v20, %v115_v21  ;;  %v2980_v40 = vcombine.low %v111_v20, %v115_v21  ;;  %959 = vmatprep.subr.bf16.mxu1 %v2967_v41  ;;  %v2983_v57 = vcombine.high %v112_v51, %v116_v52  ;;  %v120_v59 = vld [vmem:[#allocation2 + $0x148] sm:$0xff] }
  0x43   :  { %v257_v30 = vcombine.high %v3913_v25, %v3913_v25  ;;  %v119_v36 = vld [vmem:[#allocation2 + $0x140] sm:$0xff]  ;;  %v124_v60 = vld [vmem:[#allocation2 + $0x168] sm:$0xff]  ;;  %v2982_v63 = vcombine.low %v112_v51, %v116_v52 }
  0x44   :  { %v123_v37 = vld [vmem:[#allocation2 + $0x160] sm:$0xff]  ;;  %v2991_v1 = vcombine.high %v120_v59, %v124_v60  ;;  %v128_v3 = vld [vmem:[#allocation2 + $0x188] sm:$0xff]  ;;  %v2990_v7 = vcombine.low %v120_v59, %v124_v60 }
  0x45   :  { %919 = vmatpush1.bf16.msra.mxu0 %v2964_v18  ;;  %v3918_v38 = vrot.slane %v257_v30, %v3908_v23  ;;  %v2989_v42 = vcombine.high %v119_v36, %v123_v37  ;;  %v127_v45 = vld [vmem:[#allocation2 + $0x180] sm:$0xff]  ;;  %v2988_v48 = vcombine.low %v119_v36, %v123_v37  ;;  %960 = vmatpush1.bf16.msra.mxu1 %v2966_v47  ;;  %v132_v4 = vld [vmem:[#allocation2 + $0x1a8] sm:$0xff] }
  0x46   :  { %920 = vmatprep.subr.bf16.mxu0 %v2973_v19  ;;  %v131_v46 = vld [vmem:[#allocation2 + $0x1a0] sm:$0xff]  ;;  %961 = vmatprep.subr.bf16.mxu1 %v2975_v49  ;;  %v2999_v9 = vcombine.high %v128_v3, %v132_v4  ;;  %v136_v11 = vld [vmem:[#allocation2 + $0x1c8] sm:$0xff]  ;;  %v2998_v15 = vcombine.low %v128_v3, %v132_v4 }
  0x47   :  { %946 = vmatprep.mubr.bf16.mxu0 %v3918_v38  ;;  %987 = vmatprep.mubr.bf16.mxu1 %v3918_v38  ;;  %v2997_v50 = vcombine.high %v127_v45, %v131_v46  ;;  %v135_v53 = vld [vmem:[#allocation2 + $0x1c0] sm:$0xff]  ;;  %v2996_v56 = vcombine.low %v127_v45, %v131_v46  ;;  %v140_v12 = vld [vmem:[#allocation2 + $0x1e8] sm:$0xff] }
  0x48   :  { %v139_v54 = vld [vmem:[#allocation2 + $0x1e0] sm:$0xff]  ;;  %v3007_v18 = vcombine.high %v136_v11, %v140_v12  ;;  %v144_v20 = vld [vmem:[#allocation2 + $0x208] sm:$0xff]  ;;  %v3006_v26 = vcombine.low %v136_v11, %v140_v12  ;;  %v3924_v11 = vrot.slane %v3913_v25, %v3908_v23 }
  0x49   :  { %921 = vmatpush1.bf16.msra.mxu0 %v2972_v27  ;;  %v3005_v58 = vcombine.high %v135_v53, %v139_v54  ;;  %v143_v61 = vld [vmem:[#allocation2 + $0x200] sm:$0xff]  ;;  %962 = vmatpush1.bf16.msra.mxu1 %v2974_v55  ;;  %v3004_v0 = vcombine.low %v135_v53, %v139_v54  ;;  %v148_v21 = vld [vmem:[#allocation2 + $0x228] sm:$0xff] }
  0x4a   :  { %922 = vmatprep.subr.bf16.mxu0 %v2981_v32  ;;  %v147_v62 = vld [vmem:[#allocation2 + $0x220] sm:$0xff]  ;;  %963 = vmatprep.subr.bf16.mxu1 %v2983_v57  ;;  %v3015_v28 = vcombine.high %v144_v20, %v148_v21  ;;  %v152_v30 = vld [vmem:[#allocation2 + $0x248] sm:$0xff]  ;;  %v3014_v34 = vcombine.low %v144_v20, %v148_v21 }
  0x4b   :  { %v3013_v2 = vcombine.high %v143_v61, %v147_v62  ;;  %v151_v5 = vld [vmem:[#allocation2 + $0x240] sm:$0xff]  ;;  %v3012_v8 = vcombine.low %v143_v61, %v147_v62  ;;  %v156_v31 = vld [vmem:[#allocation2 + $0x268] sm:$0xff] }
  0x4c   :  { %v155_v6 = vld [vmem:[#allocation2 + $0x260] sm:$0xff]  ;;  %v3023_v36 = vcombine.high %v152_v30, %v156_v31  ;;  %v160_v39 = vld [vmem:[#allocation2 + $0x288] sm:$0xff]  ;;  %v3022_v43 = vcombine.low %v152_v30, %v156_v31  ;;  %v90_v30 = vld [vmem:[#allocation2 + $0x58] sm:$0xff] }
  0x4d   :  { %923 = vmatpush1.bf16.msra.mxu0 %v2980_v40  ;;  %964 = vmatpush1.bf16.msra.mxu1 %v2982_v63  ;;  %v3021_v10 = vcombine.high %v151_v5, %v155_v6  ;;  %v159_v13 = vld [vmem:[#allocation2 + $0x280] sm:$0xff]  ;;  %v3020_v17 = vcombine.low %v151_v5, %v155_v6  ;;  %v164_v40 = vld [vmem:[#allocation2 + $0x2a8] sm:$0xff]  ;;  %v94_v31 = vld [vmem:[#allocation2 + $0x78] sm:$0xff] }
  0x4e   :  { %924 = vmatprep.subr.bf16.mxu0 %v2989_v42  ;;  %965 = vmatprep.subr.bf16.mxu1 %v2991_v1  ;;  %v163_v14 = vld [vmem:[#allocation2 + $0x2a0] sm:$0xff]  ;;  %v3031_v45 = vcombine.high %v160_v39, %v164_v40  ;;  %v168_v47 = vld [vmem:[#allocation2 + $0x2c8] sm:$0xff]  ;;  %v3030_v51 = vcombine.low %v160_v39, %v164_v40  ;;  %v81_v1 = vld [vmem:[#allocation2 + $0x10] sm:$0xff] }
  0x4f   :  { %v3029_v19 = vcombine.high %v159_v13, %v163_v14  ;;  %v167_v22 = vld [vmem:[#allocation2 + $0x2c0] sm:$0xff]  ;;  %v3028_v27 = vcombine.low %v159_v13, %v163_v14  ;;  %v176_v55 = vld [vmem:[#allocation2 + $0x308] sm:$0xff]  ;;  %v98_v39 = vld [vmem:[#allocation2 + $0x98] sm:$0xff] }
  0x50   :  { %v171_v24 = vld [vmem:[#allocation2 + $0x2e0] sm:$0xff]  ;;  %v184_v63 = vld [vmem:[#allocation2 + $0x348] sm:$0xff]  ;;  %v102_v40 = vld [vmem:[#allocation2 + $0xb8] sm:$0xff] }
  0x51   :  { %925 = vmatpush1.bf16.msra.mxu0 %v2988_v48  ;;  %966 = vmatpush1.bf16.msra.mxu1 %v2990_v7  ;;  %v3037_v29 = vcombine.high %v167_v22, %v171_v24  ;;  %v175_v32 = vld [vmem:[#allocation2 + $0x300] sm:$0xff]  ;;  %v3036_v35 = vcombine.low %v167_v22, %v171_v24  ;;  %v172_v48 = vld [vmem:[#allocation2 + $0x2e8] sm:$0xff]  ;;  %v82_v22 = vld [vmem:[#allocation2 + $0x18] sm:$0xff] }
  0x52   :  { %926 = vmatprep.subr.bf16.mxu0 %v2997_v50  ;;  %967 = vmatprep.subr.bf16.mxu1 %v2999_v9  ;;  %v179_v33 = vld [vmem:[#allocation2 + $0x320] sm:$0xff]  ;;  %v3039_v53 = vcombine.high %v168_v47, %v172_v48  ;;  %v3038_v59 = vcombine.low %v168_v47, %v172_v48  ;;  %v192_v6 = vld [vmem:[#allocation2 + $0x388] sm:$0xff]  ;;  %v89_v9 = vld [vmem:[#allocation2 + $0x50] sm:$0xff] }
  0x53   :  { %v3045_v37 = vcombine.high %v175_v32, %v179_v33  ;;  %v183_v41 = vld [vmem:[#allocation2 + $0x340] sm:$0xff]  ;;  %v3044_v44 = vcombine.low %v175_v32, %v179_v33  ;;  %v196_v7 = vld [vmem:[#allocation2 + $0x3a8] sm:$0xff]  ;;  %v86_v24 = vld [vmem:[#allocation2 + $0x38] sm:$0xff] }
  0x54   :  { %v187_v42 = vld [vmem:[#allocation2 + $0x360] sm:$0xff]  ;;  %v200_v13 = vld [vmem:[#allocation2 + $0x3c8] sm:$0xff]  ;;  %v3062_v21 = vcombine.low %v192_v6, %v196_v7  ;;  %v113_v33 = vld [vmem:[#allocation2 + $0x110] sm:$0xff] }
  0x55   :  { %927 = vmatpush1.bf16.msra.mxu0 %v2996_v56  ;;  %968 = vmatpush1.bf16.msra.mxu1 %v2998_v15  ;;  %v3053_v46 = vcombine.high %v183_v41, %v187_v42  ;;  %v191_v49 = vld [vmem:[#allocation2 + $0x380] sm:$0xff]  ;;  %v3052_v52 = vcombine.low %v183_v41, %v187_v42  ;;  %v180_v56 = vld [vmem:[#allocation2 + $0x328] sm:$0xff]  ;;  %v3063_v15 = vcombine.high %v192_v6, %v196_v7  ;;  %v121_v42 = vld [vmem:[#allocation2 + $0x150] sm:$0xff] }
  0x56   :  { %928 = vmatprep.subr.bf16.mxu0 %v3005_v58  ;;  %969 = vmatprep.subr.bf16.mxu1 %v3007_v18  ;;  %v195_v50 = vld [vmem:[#allocation2 + $0x3a0] sm:$0xff]  ;;  %v3047_v61 = vcombine.high %v176_v55, %v180_v56  ;;  %v3046_v3 = vcombine.low %v176_v55, %v180_v56  ;;  %v204_v14 = vld [vmem:[#allocation2 + $0x3e8] sm:$0xff]  ;;  %v97_v18 = vld [vmem:[#allocation2 + $0x90] sm:$0xff] }
  0x57   :  { %v3061_v54 = vcombine.high %v191_v49, %v195_v50  ;;  %v199_v57 = vld [vmem:[#allocation2 + $0x3c0] sm:$0xff]  ;;  %v3060_v60 = vcombine.low %v191_v49, %v195_v50  ;;  %v3071_v23 = vcombine.high %v200_v13, %v204_v14  ;;  %v106_v47 = vld [vmem:[#allocation2 + $0xd8] sm:$0xff]  ;;  %v129_v50 = vld [vmem:[#allocation2 + $0x190] sm:$0xff] }
  0x58   :  { %v203_v58 = vld [vmem:[#allocation2 + $0x3e0] sm:$0xff]  ;;  %v110_v48 = vld [vmem:[#allocation2 + $0xf8] sm:$0xff] }
  0x59   :  { %929 = vmatpush1.bf16.msra.mxu0 %v3004_v0  ;;  %970 = vmatpush1.bf16.msra.mxu1 %v3006_v26  ;;  %v3069_v62 = vcombine.high %v199_v57, %v203_v58  ;;  %v188_v0 = vld [vmem:[#allocation2 + $0x368] sm:$0xff]  ;;  %v3068_v4 = vcombine.low %v199_v57, %v203_v58  ;;  %v105_v26 = vld [vmem:[#allocation2 + $0xd0] sm:$0xff]  ;;  %v114_v55 = vld [vmem:[#allocation2 + $0x118] sm:$0xff] }
  0x5a   :  { %930 = vmatprep.subr.bf16.mxu0 %v3013_v2  ;;  %971 = vmatprep.subr.bf16.mxu1 %v3015_v28  ;;  %v85_v2 = vld [vmem:[#allocation2 + $0x30] sm:$0xff]  ;;  %v3055_v5 = vcombine.high %v184_v63, %v188_v0  ;;  %v3054_v12 = vcombine.low %v184_v63, %v188_v0  ;;  %v118_v56 = vld [vmem:[#allocation2 + $0x138] sm:$0xff] }
  0x5b   :  { %v137_v58 = vld [vmem:[#allocation2 + $0x1d0] sm:$0xff]  ;;  %v126_v63 = vld [vmem:[#allocation2 + $0x178] sm:$0xff] }
  0x5c   :  { %v130_v6 = vld [vmem:[#allocation2 + $0x198] sm:$0xff] }
  0x5d   :  { %931 = vmatpush1.bf16.msra.mxu0 %v3012_v8  ;;  %972 = vmatpush1.bf16.msra.mxu1 %v3014_v34  ;;  %v2953_v8 = vcombine.high %v81_v1, %v85_v2  ;;  %v117_v34 = vld [vmem:[#allocation2 + $0x130] sm:$0xff]  ;;  %v134_v7 = vld [vmem:[#allocation2 + $0x1b8] sm:$0xff] }
  0x5e   :  { %932 = vmatprep.subr.bf16.mxu0 %v3021_v10  ;;  %973 = vmatprep.subr.bf16.mxu1 %v3023_v36  ;;  %v93_v10 = vld [vmem:[#allocation2 + $0x70] sm:$0xff]  ;;  %v2984_v49 = vcombine.low %v113_v33, %v117_v34 }
  0x5f   :  { %v2961_v20 = vcombine.high %v89_v9, %v93_v10  ;;  %v2960_v25 = vcombine.low %v89_v9, %v93_v10  ;;  %v153_v9 = vld [vmem:[#allocation2 + $0x250] sm:$0xff] }
  0x60   :  { %v157_v10 = vld [vmem:[#allocation2 + $0x270] sm:$0xff] }
  0x61   :  { %933 = vmatpush1.bf16.msra.mxu0 %v3020_v17  ;;  %974 = vmatpush1.bf16.msra.mxu1 %v3022_v43  ;;  %v2952_v17 = vcombine.low %v81_v1, %v85_v2  ;;  %v125_v43 = vld [vmem:[#allocation2 + $0x170] sm:$0xff] }
  0x62   :  { %934 = vmatprep.subr.bf16.mxu0 %v3029_v19  ;;  %975 = vmatprep.subr.bf16.mxu1 %v3031_v45  ;;  %v101_v19 = vld [vmem:[#allocation2 + $0xb0] sm:$0xff]  ;;  %v2985_v45 = vcombine.high %v113_v33, %v117_v34  ;;  %v2992_v57 = vcombine.low %v121_v42, %v125_v43  ;;  %v158_v33 = vld [vmem:[#allocation2 + $0x278] sm:$0xff] }
  0x63   :  { %v2969_v28 = vcombine.high %v97_v18, %v101_v19  ;;  %v2968_v32 = vcombine.low %v97_v18, %v101_v19  ;;  %v145_v1 = vld [vmem:[#allocation2 + $0x210] sm:$0xff] }
  0x64   :  { %v149_v2 = vld [vmem:[#allocation2 + $0x230] sm:$0xff] }
  0x65   :  { %935 = vmatpush1.bf16.msra.mxu0 %v3028_v27  ;;  %976 = vmatpush1.bf16.msra.mxu1 %v3030_v51  ;;  %v109_v27 = vld [vmem:[#allocation2 + $0xf0] sm:$0xff]  ;;  %v3016_v18 = vcombine.low %v145_v1, %v149_v2 }
  0x66   :  { %936 = vmatprep.subr.bf16.mxu0 %v3037_v29  ;;  %977 = vmatprep.subr.bf16.mxu1 %v3039_v53  ;;  %v3070_v29 = vcombine.low %v200_v13, %v204_v14  ;;  %v2977_v36 = vcombine.high %v105_v26, %v109_v27  ;;  %v2976_v41 = vcombine.low %v105_v26, %v109_v27  ;;  %v133_v51 = vld [vmem:[#allocation2 + $0x1b0] sm:$0xff] }
  0x67   :  { %v2993_v53 = vcombine.high %v121_v42, %v125_v43  ;;  %v3000_v0 = vcombine.low %v129_v50, %v133_v51  ;;  %v3017_v13 = vcombine.high %v145_v1, %v149_v2  ;;  %v161_v19 = vld [vmem:[#allocation2 + $0x290] sm:$0xff]  ;;  %v3024_v26 = vcombine.low %v153_v9, %v157_v10  ;;  %v166_v42 = vld [vmem:[#allocation2 + $0x2b8] sm:$0xff] }
  0x68   :  { %v169_v27 = vld [vmem:[#allocation2 + $0x2d0] sm:$0xff]  ;;  %v190_v1 = vld [vmem:[#allocation2 + $0x378] sm:$0xff] }
  0x69   :  { %937 = vmatpush1.bf16.msra.mxu0 %v3036_v35  ;;  %978 = vmatpush1.bf16.msra.mxu1 %v3038_v59  ;;  %v2955_v35 = vcombine.high %v82_v22, %v86_v24  ;;  %v141_v59 = vld [vmem:[#allocation2 + $0x1f0] sm:$0xff] }
  0x6a   :  { %938 = vmatprep.subr.bf16.mxu0 %v3045_v37  ;;  %979 = vmatprep.subr.bf16.mxu1 %v3047_v61  ;;  %v2954_v37 = vcombine.low %v82_v22, %v86_v24  ;;  %v2978_v61 = vcombine.low %v106_v47, %v110_v48  ;;  %v3025_v22 = vcombine.high %v153_v9, %v157_v10 }
  0x6b   :  { %v3002_v24 = vcombine.low %v130_v6, %v134_v7 }
  0x6d   :  { %939 = vmatpush1.bf16.msra.mxu0 %v3044_v44  ;;  %980 = vmatpush1.bf16.msra.mxu1 %v3046_v3  ;;  %v2963_v44 = vcombine.high %v90_v30, %v94_v31  ;;  %v2987_v3 = vcombine.high %v114_v55, %v118_v56 }
  0x6e   :  { %940 = vmatprep.subr.bf16.mxu0 %v3053_v46  ;;  %981 = vmatprep.subr.bf16.mxu1 %v3055_v5  ;;  %v2962_v46 = vcombine.low %v90_v30, %v94_v31  ;;  %v2986_v5 = vcombine.low %v114_v55, %v118_v56 }
  0x71   :  { %941 = vmatpush1.bf16.msra.mxu0 %v3052_v52  ;;  %982 = vmatpush1.bf16.msra.mxu1 %v3054_v12  ;;  %v2971_v52 = vcombine.high %v98_v39, %v102_v40 }
  0x72   :  { %942 = vmatprep.subr.bf16.mxu0 %v3061_v54  ;;  %983 = vmatprep.subr.bf16.mxu1 %v3063_v15  ;;  %v2970_v54 = vcombine.low %v98_v39, %v102_v40  ;;  %v138_v15 = vld [vmem:[#allocation2 + $0x1d8] sm:$0xff] }
  0x75   :  { %943 = vmatpush1.bf16.msra.mxu0 %v3060_v60  ;;  %984 = vmatpush1.bf16.msra.mxu1 %v3062_v21  ;;  %v2979_v60 = vcombine.high %v106_v47, %v110_v48  ;;  %v3003_v21 = vcombine.high %v130_v6, %v134_v7  ;;  %v194_v7 = vld [vmem:[#allocation2 + $0x398] sm:$0xff] }
  0x76   :  { %944 = vmatprep.subr.bf16.mxu0 %v3069_v62  ;;  %985 = vmatprep.subr.bf16.mxu1 %v3071_v23  ;;  %v122_v62 = vld [vmem:[#allocation2 + $0x158] sm:$0xff] }
  0x77   :  { %v2995_v12 = vcombine.high %v122_v62, %v126_v63  ;;  %v2994_v14 = vcombine.low %v122_v62, %v126_v63  ;;  %v146_v23 = vld [vmem:[#allocation2 + $0x218] sm:$0xff] }
  0x79   :  { %945 = vmatpush1.bf16.msra.mxu0 %v3068_v4  ;;  %986 = vmatpush1.bf16.msra.mxu1 %v3070_v29  ;;  %v3009_v4 = vcombine.high %v137_v58, %v141_v59 }
  0x7a   :  { %996 = vmatprep.subr.bf16.mxu0 %v2953_v8  ;;  %1037 = vmatprep.subr.bf16.mxu1 %v2955_v35  ;;  %v3008_v8 = vcombine.low %v137_v58, %v141_v59  ;;  %v177_v35 = vld [vmem:[#allocation2 + $0x310] sm:$0xff]  ;;  %v182_v58 = vld [vmem:[#allocation2 + $0x338] sm:$0xff] }
  0x7c   :  { %947 = vmatmul.mubr.bf16.vlgmr.msra.gmra.mrb[0].mxu0 %v3924_v11  ;;  %988 = vmatmul.mubr.bf16.vlgmr.msra.gmra.mrb[0].mxu1 %v3924_v11 }
  0x7d   :  { %997 = vmatpush1.bf16.msra.mxu0 %v2952_v17  ;;  %1028 = vmatprep.mubr.bf16.mxu0 %v3918_v38  ;;  %v142_v17 = vld [vmem:[#allocation2 + $0x1f8] sm:$0xff] }
  0x7e   :  { %998 = vmatprep.subr.bf16.mxu0 %v2961_v20  ;;  %1038 = vmatpush1.bf16.msra.mxu1 %v2954_v37  ;;  %v165_v20 = vld [vmem:[#allocation2 + $0x2b0] sm:$0xff]  ;;  %v3011_v29 = vcombine.high %v138_v15, %v142_v17  ;;  %v3010_v31 = vcombine.low %v138_v15, %v142_v17  ;;  %v202_v15 = vld [vmem:[#allocation2 + $0x3d8] sm:$0xff] }
  0x7f   :  { %1069 = vmatprep.mubr.bf16.mxu1 %v3918_v38  ;;  %1039 = vmatprep.subr.bf16.mxu1 %v2963_v44  ;;  %v3001_v38 = vcombine.high %v129_v50, %v133_v51  ;;  %v3033_v30 = vcombine.high %v161_v19, %v165_v20  ;;  %v3032_v34 = vcombine.low %v161_v19, %v165_v20  ;;  %v185_v44 = vld [vmem:[#allocation2 + $0x350] sm:$0xff]  ;;  %v174_v50 = vld [vmem:[#allocation2 + $0x2f8] sm:$0xff]  ;;  %v3393_v20 = vld [vmem:[#allocation5 + $0x24] ss:$8 sps:$4 sm:$0xff]  }
  0x80   :  { %v206_v17 = vld [vmem:[#allocation2 + $0x3f8] sm:$0xff] }
  0x81   :  { %999 = vmatpush1.bf16.msra.mxu0 %v2960_v25  ;;  %v150_v25 = vld [vmem:[#allocation2 + $0x238] sm:$0xff] }
  0x82   :  { %1000 = vmatprep.subr.bf16.mxu0 %v2969_v28  ;;  %1040 = vmatpush1.bf16.msra.mxu1 %v2962_v46  ;;  %v173_v28 = vld [vmem:[#allocation2 + $0x2f0] sm:$0xff]  ;;  %v3019_v37 = vcombine.high %v146_v23, %v150_v25  ;;  %v3018_v40 = vcombine.low %v146_v23, %v150_v25  ;;  %v3074_v25 = vcombine.low %v202_v15, %v206_v17 }
  0x83   :  { %1041 = vmatprep.subr.bf16.mxu1 %v2971_v52  ;;  %v3041_v39 = vcombine.high %v169_v27, %v173_v28  ;;  %v3040_v43 = vcombine.low %v169_v27, %v173_v28  ;;  %v193_v52 = vld [vmem:[#allocation2 + $0x390] sm:$0xff]  ;;  %v3399_v27 = vld [vmem:[#allocation5 + $0x44] ss:$8 sps:$4 sm:$0xff]   ;;  %v3397_v28 = vld [vmem:[#allocation5 + $0x40] ss:$8 sps:$4 sm:$0xff]  }
  0x84   :  { %v3388_v19 = vld [vmem:[#allocation5 + $0x10] ss:$8 sps:$4 sm:$0xff]   ;;  %v3396_v23 = vld [vmem:[#allocation5 + $0x34] ss:$8 sps:$4 sm:$0xff]  }
  0x85   :  { %1001 = vmatpush1.bf16.msra.mxu0 %v2968_v32  ;;  %v154_v32 = vld [vmem:[#allocation2 + $0x258] sm:$0xff] }
  0x86   :  { %1002 = vmatprep.subr.bf16.mxu0 %v2977_v36  ;;  %1042 = vmatpush1.bf16.msra.mxu1 %v2970_v54  ;;  %v181_v36 = vld [vmem:[#allocation2 + $0x330] sm:$0xff]  ;;  %v3027_v46 = vcombine.high %v154_v32, %v158_v33  ;;  %v3026_v48 = vcombine.low %v154_v32, %v158_v33  ;;  %v3403_v32 = vld [vmem:[#allocation5 + $0x60] ss:$8 sps:$4 sm:$0xff]  }
  0x87   :  { %1043 = vmatprep.subr.bf16.mxu1 %v2979_v60  ;;  %v3049_v47 = vcombine.high %v177_v35, %v181_v36  ;;  %v3048_v51 = vcombine.low %v177_v35, %v181_v36  ;;  %v201_v60 = vld [vmem:[#allocation2 + $0x3d0] sm:$0xff]  ;;  %v3411_v35 = vld [vmem:[#allocation5 + $0x84] ss:$8 sps:$4 sm:$0xff]   ;;  %v3409_v36 = vld [vmem:[#allocation5 + $0x80] ss:$8 sps:$4 sm:$0xff]  }
  0x88   :  { %v3408_v33 = vld [vmem:[#allocation5 + $0x74] ss:$8 sps:$4 sm:$0xff]  }
  0x89   :  { %1003 = vmatpush1.bf16.msra.mxu0 %v2976_v41  ;;  %v162_v41 = vld [vmem:[#allocation2 + $0x298] sm:$0xff] }
  0x8a   :  { %1004 = vmatprep.subr.bf16.mxu0 %v2985_v45  ;;  %1044 = vmatpush1.bf16.msra.mxu1 %v2978_v61  ;;  %v189_v45 = vld [vmem:[#allocation2 + $0x370] sm:$0xff]  ;;  %v3035_v54 = vcombine.high %v162_v41, %v166_v42  ;;  %v3034_v56 = vcombine.low %v162_v41, %v166_v42 }
  0x8b   :  { %1045 = vmatprep.subr.bf16.mxu1 %v2987_v3  ;;  %v3057_v55 = vcombine.high %v185_v44, %v189_v45  ;;  %v3056_v59 = vcombine.low %v185_v44, %v189_v45  ;;  %v3420_v41 = vld [vmem:[#allocation5 + $0xb4] ss:$8 sps:$4 sm:$0xff]   ;;  %v3418_v42 = vld [vmem:[#allocation5 + $0xb0] ss:$8 sps:$4 sm:$0xff]   ;;  %v3421_v44 = vld [vmem:[#allocation5 + $0xc0] ss:$8 sps:$4 sm:$0xff]  }
  0x8c   :  { %v3426_v45 = vld [vmem:[#allocation5 + $0xd4] ss:$8 sps:$4 sm:$0xff]  }
  0x8d   :  { %1005 = vmatpush1.bf16.msra.mxu0 %v2984_v49  ;;  %v170_v49 = vld [vmem:[#allocation2 + $0x2d8] sm:$0xff] }
  0x8e   :  { %1006 = vmatprep.subr.bf16.mxu0 %v2993_v53  ;;  %1046 = vmatpush1.bf16.msra.mxu1 %v2986_v5  ;;  %v197_v53 = vld [vmem:[#allocation2 + $0x3b0] sm:$0xff]  ;;  %v3043_v61 = vcombine.high %v170_v49, %v174_v50  ;;  %v3042_v63 = vcombine.low %v170_v49, %v174_v50  ;;  %v3387_v5 = vld [vmem:[#allocation5 + $0x4] ss:$8 sps:$4 sm:$0xff]  }
  0x8f   :  { %1047 = vmatprep.subr.bf16.mxu1 %v2995_v12  ;;  %v3065_v62 = vcombine.high %v193_v52, %v197_v53  ;;  %v3064_v2 = vcombine.low %v193_v52, %v197_v53  ;;  %v3385_v12 = vld [vmem:[#allocation5] ss:$8 sps:$4 sm:$0xff]   ;;  %v3432_v49 = vld [vmem:[#allocation5 + $0xf4] ss:$8 sps:$4 sm:$0xff]   ;;  %v3430_v50 = vld [vmem:[#allocation5 + $0xf0] ss:$8 sps:$4 sm:$0xff]  }
  0x90   :  { %v211_v52 = vsub.s32 0, %v3905_v16  ;;  %v3936_v53 = vld [vmem:[%s4107_s2] sm:$0xff] }
  0x91   :  { %1007 = vmatpush1.bf16.msra.mxu0 %v2992_v57  ;;  %v178_v57 = vld [vmem:[#allocation2 + $0x318] sm:$0xff] }
  0x92   :  { %1008 = vmatprep.subr.bf16.mxu0 %v3001_v38  ;;  %1048 = vmatpush1.bf16.msra.mxu1 %v2994_v14  ;;  %v205_v38 = vld [vmem:[#allocation2 + $0x3f0] sm:$0xff]  ;;  %v3051_v3 = vcombine.high %v178_v57, %v182_v58  ;;  %v3050_v6 = vcombine.low %v178_v57, %v182_v58 }
  0x93   :  { %1049 = vmatprep.subr.bf16.mxu1 %v3003_v21  ;;  %v3072_v9 = vcombine.low %v201_v60, %v205_v38 }
  0x95   :  { %1009 = vmatpush1.bf16.msra.mxu0 %v3000_v0  ;;  %v186_v0 = vld [vmem:[#allocation2 + $0x358] sm:$0xff] }
  0x96   :  { %1010 = vmatprep.subr.bf16.mxu0 %v3009_v4  ;;  %1050 = vmatpush1.bf16.msra.mxu1 %v3002_v24  ;;  %v3073_v4 = vcombine.high %v201_v60, %v205_v38  ;;  %v3059_v10 = vcombine.high %v186_v0, %v190_v1  ;;  %v3058_v14 = vcombine.low %v186_v0, %v190_v1  ;;  %v3391_v24 = vld [vmem:[#allocation5 + $0x20] ss:$8 sps:$4 sm:$0xff]   ;;  %v223_v0 = vsub.s32 3, %v3905_v16 }
  0x97   :  { %1051 = vmatprep.subr.bf16.mxu1 %v3011_v29  ;;  %v3402_v29 = vld [vmem:[#allocation5 + $0x54] ss:$8 sps:$4 sm:$0xff]  }
  0x99   :  { %1011 = vmatpush1.bf16.msra.mxu0 %v3008_v8  ;;  %v198_v8 = vld [vmem:[#allocation2 + $0x3b8] sm:$0xff] }
  0x9a   :  { %1012 = vmatprep.subr.bf16.mxu0 %v3017_v13  ;;  %1052 = vmatpush1.bf16.msra.mxu1 %v3010_v31  ;;  %v3390_v13 = vld [vmem:[#allocation5 + $0x14] ss:$8 sps:$4 sm:$0xff]   ;;  %v3066_v21 = vcombine.low %v194_v7, %v198_v8  ;;  %v3405_v31 = vld [vmem:[#allocation5 + $0x64] ss:$8 sps:$4 sm:$0xff]  }
  0x9b   :  { %1053 = vmatprep.subr.bf16.mxu1 %v3019_v37  ;;  %v3412_v37 = vld [vmem:[#allocation5 + $0x90] ss:$8 sps:$4 sm:$0xff]  }
  0x9d   :  { %1013 = vmatpush1.bf16.msra.mxu0 %v3016_v18  ;;  %v3067_v18 = vcombine.high %v194_v7, %v198_v8  ;;  %v3441_v7 = vld [vmem:[#allocation5 + $0x124] ss:$8 sps:$4 sm:$0xff]  }
  0x9e   :  { %1014 = vmatprep.subr.bf16.mxu0 %v3025_v22  ;;  %1054 = vmatpush1.bf16.msra.mxu1 %v3018_v40  ;;  %v3075_v22 = vcombine.high %v202_v15, %v206_v17  ;;  %v3415_v40 = vld [vmem:[#allocation5 + $0xa0] ss:$8 sps:$4 sm:$0xff]   ;;  %v3444_v15 = vld [vmem:[#allocation5 + $0x134] ss:$8 sps:$4 sm:$0xff]  }
  0x9f   :  { %1055 = vmatprep.subr.bf16.mxu1 %v3027_v46  ;;  %v3424_v46 = vld [vmem:[#allocation5 + $0xd0] ss:$8 sps:$4 sm:$0xff]  }
  0xa1   :  { %1015 = vmatpush1.bf16.msra.mxu0 %v3024_v26  ;;  %v3394_v26 = vld [vmem:[#allocation5 + $0x30] ss:$8 sps:$4 sm:$0xff]  }
  0xa2   :  { %1016 = vmatprep.subr.bf16.mxu0 %v3033_v30  ;;  %1056 = vmatpush1.bf16.msra.mxu1 %v3026_v48  ;;  %v3400_v30 = vld [vmem:[#allocation5 + $0x50] ss:$8 sps:$4 sm:$0xff]   ;;  %v3427_v48 = vld [vmem:[#allocation5 + $0xe0] ss:$8 sps:$4 sm:$0xff]  }
  0xa3   :  { %1057 = vmatprep.subr.bf16.mxu1 %v3035_v54  ;;  %v215_v54 = vsub.s32 1, %v3905_v16 }
  0xa5   :  { %1017 = vmatpush1.bf16.msra.mxu0 %v3032_v34  ;;  %v3406_v34 = vld [vmem:[#allocation5 + $0x70] ss:$8 sps:$4 sm:$0xff]  }
  0xa6   :  { %1018 = vmatprep.subr.bf16.mxu0 %v3041_v39  ;;  %1058 = vmatpush1.bf16.msra.mxu1 %v3034_v56  ;;  %v3417_v39 = vld [vmem:[#allocation5 + $0xa4] ss:$8 sps:$4 sm:$0xff]   ;;  %v216_v56 = vrot.slane %v3936_v53, %v215_v54 }
  0xa7   :  { %1059 = vmatprep.subr.bf16.mxu1 %v3043_v61 }
  0xa9   :  { %1019 = vmatpush1.bf16.msra.mxu0 %v3040_v43  ;;  %v3423_v43 = vld [vmem:[#allocation5 + $0xc4] ss:$8 sps:$4 sm:$0xff]  }
  0xaa   :  { %1020 = vmatprep.subr.bf16.mxu0 %v3049_v47  ;;  %1060 = vmatpush1.bf16.msra.mxu1 %v3042_v63  ;;  %v3429_v47 = vld [vmem:[#allocation5 + $0xe4] ss:$8 sps:$4 sm:$0xff]  }
  0xab   :  { %1061 = vmatprep.subr.bf16.mxu1 %v3051_v3 }
  0xad   :  { %1021 = vmatpush1.bf16.msra.mxu0 %v3048_v51  ;;  %v3435_v51 = vld [vmem:[#allocation5 + $0x104] ss:$8 sps:$4 sm:$0xff]  }
  0xae   :  { %1022 = vmatprep.subr.bf16.mxu0 %v3057_v55  ;;  %1062 = vmatpush1.bf16.msra.mxu1 %v3050_v6  ;;  %v212_v55 = vrot.slane %v3936_v53, %v211_v52  ;;  %v3436_v6 = vld [vmem:[#allocation5 + $0x110] ss:$8 sps:$4 sm:$0xff]  }
  0xaf   :  { %1063 = vmatprep.subr.bf16.mxu1 %v3059_v10 }
  0xb1   :  { %1023 = vmatpush1.bf16.msra.mxu0 %v3056_v59 }
  0xb2   :  { %1024 = vmatprep.subr.bf16.mxu0 %v3065_v62  ;;  %1064 = vmatpush1.bf16.msra.mxu1 %v3058_v14 }
  0xb3   :  { %1065 = vmatprep.subr.bf16.mxu1 %v3067_v18 }
  0xb5   :  { %1025 = vmatpush1.bf16.msra.mxu0 %v3064_v2  ;;  %v3433_v2 = vld [vmem:[#allocation5 + $0x100] ss:$8 sps:$4 sm:$0xff]  }
  0xb6   :  { %1026 = vmatprep.subr.bf16.mxu0 %v3073_v4  ;;  %1066 = vmatpush1.bf16.msra.mxu1 %v3066_v21  ;;  %v3438_v4 = vld [vmem:[#allocation5 + $0x114] ss:$8 sps:$4 sm:$0xff]   ;;  %v3445_v21 = vld [vmem:[#allocation5 + $0x140] ss:$8 sps:$4 sm:$0xff]  }
  0xb7   :  { %1067 = vmatprep.subr.bf16.mxu1 %v3075_v22  ;;  %v3450_v22 = vld [vmem:[#allocation5 + $0x154] ss:$8 sps:$4 sm:$0xff]  }
  0xb9   :  { %1027 = vmatpush1.bf16.msra.mxu0 %v3072_v9 }
  0xba   :  { %1862 = vmatprep.subr.bf16.mxu0 %v3387_v5  ;;  %1068 = vmatpush1.bf16.msra.mxu1 %v3074_v25  ;;  %v224_v5 = vrot.slane %v3936_v53, %v223_v0  ;;  %v3451_v25 = vld [vmem:[#allocation5 + $0x160] ss:$8 sps:$4 sm:$0xff]  }
  0xbc   :  { %1029 = vmatmul.mubr.bf16.vlgmr.msra.gmra.mrb[4].mxu0 %v3924_v11 }
  0xbd   :  { %1863 = vmatpush1.bf16.msra.mxu0 %v3385_v12  ;;  %1070 = vmatmul.mubr.bf16.vlgmr.msra.gmra.mrb[4].mxu1 %v3924_v11  ;;  %v3414_v11 = vld [vmem:[#allocation5 + $0x94] ss:$8 sps:$4 sm:$0xff]  }
  0xbe   :  { %1864 = vmatprep.subr.bf16.mxu0 %v3390_v13  ;;  %v3439_v13 = vld [vmem:[#allocation5 + $0x120] ss:$8 sps:$4 sm:$0xff]  }
  0xc1   :  { %1865 = vmatpush1.bf16.msra.mxu0 %v3388_v19  ;;  %v3442_v19 = vld [vmem:[#allocation5 + $0x130] ss:$8 sps:$4 sm:$0xff]  }
  0xc2   :  { %1866 = vmatprep.subr.bf16.mxu0 %v3393_v20  ;;  %v3447_v20 = vld [vmem:[#allocation5 + $0x144] ss:$8 sps:$4 sm:$0xff]  }
  0xc5   :  { %1867 = vmatpush1.bf16.msra.mxu0 %v3391_v24  ;;  %v3448_v24 = vld [vmem:[#allocation5 + $0x150] ss:$8 sps:$4 sm:$0xff]  }
  0xc6   :  { %1868 = vmatprep.subr.bf16.mxu0 %v3396_v23  ;;  %v3453_v23 = vld [vmem:[#allocation5 + $0x164] ss:$8 sps:$4 sm:$0xff]  }
  0xc9   :  { %1869 = vmatpush1.bf16.msra.mxu0 %v3394_v26  ;;  %v3456_v26 = vld [vmem:[#allocation5 + $0x174] ss:$8 sps:$4 sm:$0xff]  }
  0xca   :  { %1870 = vmatprep.subr.bf16.mxu0 %v3399_v27  ;;  %v3454_v27 = vld [vmem:[#allocation5 + $0x170] ss:$8 sps:$4 sm:$0xff]  }
  0xcd   :  { %1871 = vmatpush1.bf16.msra.mxu0 %v3397_v28  ;;  %v3459_v28 = vld [vmem:[#allocation5 + $0x184] ss:$8 sps:$4 sm:$0xff]  }
  0xce   :  { %1872 = vmatprep.subr.bf16.mxu0 %v3402_v29  ;;  %v3457_v29 = vld [vmem:[#allocation5 + $0x180] ss:$8 sps:$4 sm:$0xff]  }
  0xd1   :  { %1873 = vmatpush1.bf16.msra.mxu0 %v3400_v30  ;;  %v3462_v30 = vld [vmem:[#allocation5 + $0x194] ss:$8 sps:$4 sm:$0xff]  }
  0xd2   :  { %1874 = vmatprep.subr.bf16.mxu0 %v3405_v31  ;;  %v3460_v31 = vld [vmem:[#allocation5 + $0x190] ss:$8 sps:$4 sm:$0xff]  }
  0xd5   :  { %1875 = vmatpush1.bf16.msra.mxu0 %v3403_v32  ;;  %v3465_v32 = vld [vmem:[#allocation5 + $0x1a4] ss:$8 sps:$4 sm:$0xff]  }
  0xd6   :  { %1876 = vmatprep.subr.bf16.mxu0 %v3408_v33  ;;  %v3463_v33 = vld [vmem:[#allocation5 + $0x1a0] ss:$8 sps:$4 sm:$0xff]  }
  0xd9   :  { %1877 = vmatpush1.bf16.msra.mxu0 %v3406_v34  ;;  %v3468_v34 = vld [vmem:[#allocation5 + $0x1b4] ss:$8 sps:$4 sm:$0xff]  }
  0xda   :  { %1878 = vmatprep.subr.bf16.mxu0 %v3411_v35  ;;  %v3466_v35 = vld [vmem:[#allocation5 + $0x1b0] ss:$8 sps:$4 sm:$0xff]  }
  0xdd   :  { %1879 = vmatpush1.bf16.msra.mxu0 %v3409_v36  ;;  %v3471_v36 = vld [vmem:[#allocation5 + $0x1c4] ss:$8 sps:$4 sm:$0xff]  }
  0xde   :  { %1880 = vmatprep.subr.bf16.mxu0 %v3414_v11  ;;  %v219_v11 = vsub.s32 2, %v3905_v16 }
  0xe1   :  { %1881 = vmatpush1.bf16.msra.mxu0 %v3412_v37  ;;  %v3469_v37 = vld [vmem:[#allocation5 + $0x1c0] ss:$8 sps:$4 sm:$0xff]  }
  0xe2   :  { %1882 = vmatprep.subr.bf16.mxu0 %v3417_v39  ;;  %v3474_v39 = vld [vmem:[#allocation5 + $0x1d4] ss:$8 sps:$4 sm:$0xff]  }
  0xe5   :  { %1883 = vmatpush1.bf16.msra.mxu0 %v3415_v40  ;;  %v220_v40 = vrot.slane %v3936_v53, %v219_v11 }
  0xe6   :  { %1884 = vmatprep.subr.bf16.mxu0 %v3420_v41  ;;  %v3472_v41 = vld [vmem:[#allocation5 + $0x1d0] ss:$8 sps:$4 sm:$0xff]  }
  0xe9   :  { %1885 = vmatpush1.bf16.msra.mxu0 %v3418_v42  ;;  %v231_v42 = vsub.s32 5, %v3905_v16 }
  0xea   :  { %1886 = vmatprep.subr.bf16.mxu0 %v3423_v43  ;;  %v3477_v43 = vld [vmem:[#allocation5 + $0x1e4] ss:$8 sps:$4 sm:$0xff]  }
  0xed   :  { %1887 = vmatpush1.bf16.msra.mxu0 %v3421_v44 }
  0xee   :  { %1888 = vmatprep.subr.bf16.mxu0 %v3426_v45  ;;  %v3475_v45 = vld [vmem:[#allocation5 + $0x1e0] ss:$8 sps:$4 sm:$0xff]  }
  0xf1   :  { %1889 = vmatpush1.bf16.msra.mxu0 %v3424_v46  ;;  %v232_v46 = vrot.slane %v3936_v53, %v231_v42  ;;  %v3508_v42 = vld [vmem:[#allocation5 + $0x290] ss:$8 sps:$4 sm:$0xff]  }
  0xf2   :  { %1890 = vmatprep.subr.bf16.mxu0 %v3429_v47  ;;  %v3480_v47 = vld [vmem:[#allocation5 + $0x1f4] ss:$8 sps:$4 sm:$0xff]  }
  0xf5   :  { %1891 = vmatpush1.bf16.msra.mxu0 %v3427_v48 }
  0xf6   :  { %1892 = vmatprep.subr.bf16.mxu0 %v3432_v49 }
  0xf9   :  { %1893 = vmatpush1.bf16.msra.mxu0 %v3430_v50 }
  0xfa   :  { %1903 = vmatprep.subr.bf16.mxu0 %v3435_v51  ;;  %v3478_v51 = vld [vmem:[#allocation5 + $0x1f0] ss:$8 sps:$4 sm:$0xff]  }
 0x14f   :  { %v948_v57 = vpop.f32.mrb[0].mxu0  ;;  %v989_v8 = vpop.f32.mrb[0].mxu1 }
 0x150   :  { %v949_v58 = vadd.f32 %v948_v57, %v212_v55  ;;  %v950_v59 = vpop.f32.mrb[1].mxu0  ;;  %v991_v9 = vpop.f32.mrb[1].mxu1  ;;  %v990_v44 = vadd.f32 %v989_v8, %v220_v40  ;;  %v3483_v57 = vld [vmem:[#allocation5 + $0x204] ss:$8 sps:$4 sm:$0xff]   ;;  %v3601_v40 = vld [vmem:[#allocation7 + $0x100] ss:$16 sps:$4 sm:$0xff]  }
 0x151   :  { %v951_v60 = vadd.f32 %v950_v59, %v216_v56  ;;  %v952_v38 = vpop.f32.mrb[2].mxu0  ;;  %v992_v10 = vadd.f32 %v991_v9, %v224_v5  ;;  %v993_v12 = vpop.f32.mrb[2].mxu1  ;;  %v3585_v9 = vld [vmem:[#allocation7 + $0x44] ss:$16 sps:$4 sm:$0xff]  }
 0x152   :  { %v1078_v61 = vmax.f32 %v949_v58, 0.0  ;;  %v953_v62 = vpop.f32.mrb[3].mxu0  ;;  %v994_v14 = vpop.f32.mrb[3].mxu1  ;;  %v1080_v49 = vmax.f32 %v990_v44, 0.0  ;;  %v3481_v38 = vld [vmem:[#allocation5 + $0x200] ss:$8 sps:$4 sm:$0xff]  }
 0x153   :  { %v1079_v63 = vmax.f32 %v951_v60, 0.0  ;;  %v1081_v17 = vmax.f32 %v992_v10, 0.0  ;;  %v3486_v62 = vld [vmem:[#allocation5 + $0x214] ss:$8 sps:$4 sm:$0xff]   ;;  %v3487_v10 = vld [vmem:[#allocation5 + $0x220] ss:$8 sps:$4 sm:$0xff]  }
 0x154   :  { %v1086_v3 = vpack.c.bf16 %v1078_v61, %v1078_v61  ;;  %v1088_v60 = vpack.c.bf16 %v1080_v49, %v1080_v49  ;;  %v3583_v14 = vld [vmem:[#allocation7 + $0x40] ss:$16 sps:$4 sm:$0xff]  }
 0x155   :  { %v1087_v1 = vpack.c.bf16 %v1079_v63, %v1079_v63  ;;  %v1089_v18 = vpack.c.bf16 %v1081_v17, %v1081_v17  ;;  %v3577_v63 = vld [vmem:[#allocation7] ss:$16 sps:$4 sm:$0xff]  }
 0x156   :  { %v3490_v17 = vld [vmem:[#allocation5 + $0x230] ss:$8 sps:$4 sm:$0xff]  }
 0x157   :  { %1894 = vmatprep.mubr.bf16.mxu0 %v1087_v1  ;;  %v3579_v1 = vld [vmem:[#allocation7 + $0x4] ss:$16 sps:$4 sm:$0xff]   ;;  %v3604_v44 = vld [vmem:[#allocation7 + $0x120] ss:$16 sps:$4 sm:$0xff]  }
 0x158   :  { %1895 = vmatmul.mubr.bf16.vlgmr.msra.gmra.mrb[8].mxu0 %v1086_v3  ;;  %v3582_v3 = vld [vmem:[#allocation7 + $0x24] ss:$16 sps:$4 sm:$0xff]   ;;  %2432 = vmatprep.subr.bf16.mxu1 %v3579_v1  ;;  %v3607_v49 = vld [vmem:[#allocation7 + $0x140] ss:$16 sps:$4 sm:$0xff]  }
 0x159   :  { %1904 = vmatpush1.bf16.msra.mxu0 %v3433_v2  ;;  %1935 = vmatprep.mubr.bf16.mxu0 %v1089_v18  ;;  %v3484_v2 = vld [vmem:[#allocation5 + $0x210] ss:$8 sps:$4 sm:$0xff]   ;;  %v3495_v18 = vld [vmem:[#allocation5 + $0x244] ss:$8 sps:$4 sm:$0xff]  }
 0x15a   :  { %1905 = vmatprep.subr.bf16.mxu0 %v3438_v4  ;;  %v3489_v4 = vld [vmem:[#allocation5 + $0x224] ss:$8 sps:$4 sm:$0xff]   ;;  %2433 = vmatpush1.bf16.msra.mxu1 %v3577_v63  ;;  %v3520_v1 = vld [vmem:[#allocation5 + $0x2d0] ss:$8 sps:$4 sm:$0xff]  }
 0x15b   :  { %2434 = vmatprep.subr.bf16.mxu1 %v3582_v3  ;;  %v3618_v63 = vld [vmem:[#allocation7 + $0x1a4] ss:$16 sps:$4 sm:$0xff]  }
 0x15c   :  { %v3525_v3 = vld [vmem:[#allocation5 + $0x2e4] ss:$8 sps:$4 sm:$0xff]  }
 0x15d   :  { %1906 = vmatpush1.bf16.msra.mxu0 %v3436_v6 }
 0x15e   :  { %1907 = vmatprep.subr.bf16.mxu0 %v3441_v7  ;;  %v3580_v7 = vld [vmem:[#allocation7 + $0x20] ss:$16 sps:$4 sm:$0xff]  }
 0x15f   :  { %2435 = vmatpush1.bf16.msra.mxu1 %v3580_v7 }
 0x160   :  { %2436 = vmatprep.subr.bf16.mxu1 %v3585_v9  ;;  %v3523_v9 = vld [vmem:[#allocation5 + $0x2e0] ss:$8 sps:$4 sm:$0xff]  }
 0x161   :  { %1908 = vmatpush1.bf16.msra.mxu0 %v3439_v13  ;;  %v3492_v13 = vld [vmem:[#allocation5 + $0x234] ss:$8 sps:$4 sm:$0xff]  }
 0x162   :  { %1909 = vmatprep.subr.bf16.mxu0 %v3444_v15  ;;  %v3588_v15 = vld [vmem:[#allocation7 + $0x64] ss:$16 sps:$4 sm:$0xff]  }
 0x163   :  { %2437 = vmatpush1.bf16.msra.mxu1 %v3583_v14 }
 0x164   :  { %2438 = vmatprep.subr.bf16.mxu1 %v3588_v15  ;;  %v3624_v15 = vld [vmem:[#allocation7 + $0x1e4] ss:$16 sps:$4 sm:$0xff]  }
 0x165   :  { %1910 = vmatpush1.bf16.msra.mxu0 %v3442_v19  ;;  %v3586_v19 = vld [vmem:[#allocation7 + $0x60] ss:$16 sps:$4 sm:$0xff]  }
 0x166   :  { %1911 = vmatprep.subr.bf16.mxu0 %v3447_v20  ;;  %v3591_v20 = vld [vmem:[#allocation7 + $0x84] ss:$16 sps:$4 sm:$0xff]  }
 0x167   :  { %2439 = vmatpush1.bf16.msra.mxu1 %v3586_v19  ;;  %v3531_v19 = vld [vmem:[#allocation5 + $0x304] ss:$8 sps:$4 sm:$0xff]  }
 0x168   :  { %2440 = vmatprep.subr.bf16.mxu1 %v3591_v20 }
 0x169   :  { %1912 = vmatpush1.bf16.msra.mxu0 %v3445_v21  ;;  %v3493_v21 = vld [vmem:[#allocation5 + $0x240] ss:$8 sps:$4 sm:$0xff]  }
 0x16a   :  { %1913 = vmatprep.subr.bf16.mxu0 %v3450_v22  ;;  %v3498_v22 = vld [vmem:[#allocation5 + $0x254] ss:$8 sps:$4 sm:$0xff]  }
 0x16d   :  { %1914 = vmatpush1.bf16.msra.mxu0 %v3448_v24  ;;  %v3589_v24 = vld [vmem:[#allocation7 + $0x80] ss:$16 sps:$4 sm:$0xff]  }
 0x16e   :  { %1915 = vmatprep.subr.bf16.mxu0 %v3453_v23  ;;  %v3594_v23 = vld [vmem:[#allocation7 + $0xa4] ss:$16 sps:$4 sm:$0xff]   ;;  %2441 = vmatpush1.bf16.msra.mxu1 %v3589_v24  ;;  %v3532_v24 = vld [vmem:[#allocation5 + $0x310] ss:$8 sps:$4 sm:$0xff]  }
 0x16f   :  { %2442 = vmatprep.subr.bf16.mxu1 %v3594_v23  ;;  %v3537_v23 = vld [vmem:[#allocation5 + $0x324] ss:$8 sps:$4 sm:$0xff]  }
 0x171   :  { %1916 = vmatpush1.bf16.msra.mxu0 %v3451_v25  ;;  %v3496_v25 = vld [vmem:[#allocation5 + $0x250] ss:$8 sps:$4 sm:$0xff]  }
 0x172   :  { %1917 = vmatprep.subr.bf16.mxu0 %v3456_v26  ;;  %v3501_v26 = vld [vmem:[#allocation5 + $0x264] ss:$8 sps:$4 sm:$0xff]  }
 0x175   :  { %1918 = vmatpush1.bf16.msra.mxu0 %v3454_v27  ;;  %v3592_v27 = vld [vmem:[#allocation7 + $0xa0] ss:$16 sps:$4 sm:$0xff]  }
 0x176   :  { %1919 = vmatprep.subr.bf16.mxu0 %v3459_v28  ;;  %v3597_v28 = vld [vmem:[#allocation7 + $0xc4] ss:$16 sps:$4 sm:$0xff]   ;;  %2443 = vmatpush1.bf16.msra.mxu1 %v3592_v27  ;;  %v3538_v27 = vld [vmem:[#allocation5 + $0x330] ss:$8 sps:$4 sm:$0xff]  }
 0x177   :  { %2444 = vmatprep.subr.bf16.mxu1 %v3597_v28  ;;  %v3543_v28 = vld [vmem:[#allocation5 + $0x344] ss:$8 sps:$4 sm:$0xff]  }
 0x179   :  { %1920 = vmatpush1.bf16.msra.mxu0 %v3457_v29  ;;  %v3499_v29 = vld [vmem:[#allocation5 + $0x260] ss:$8 sps:$4 sm:$0xff]  }
 0x17a   :  { %1921 = vmatprep.subr.bf16.mxu0 %v3462_v30  ;;  %v3504_v30 = vld [vmem:[#allocation5 + $0x274] ss:$8 sps:$4 sm:$0xff]  }
 0x17d   :  { %1922 = vmatpush1.bf16.msra.mxu0 %v3460_v31  ;;  %v3595_v31 = vld [vmem:[#allocation7 + $0xc0] ss:$16 sps:$4 sm:$0xff]  }
 0x17e   :  { %1923 = vmatprep.subr.bf16.mxu0 %v3465_v32  ;;  %v3600_v32 = vld [vmem:[#allocation7 + $0xe4] ss:$16 sps:$4 sm:$0xff]   ;;  %2445 = vmatpush1.bf16.msra.mxu1 %v3595_v31  ;;  %v3544_v31 = vld [vmem:[#allocation5 + $0x350] ss:$8 sps:$4 sm:$0xff]  }
 0x17f   :  { %2446 = vmatprep.subr.bf16.mxu1 %v3600_v32  ;;  %v3549_v32 = vld [vmem:[#allocation5 + $0x364] ss:$8 sps:$4 sm:$0xff]  }
 0x181   :  { %1924 = vmatpush1.bf16.msra.mxu0 %v3463_v33  ;;  %v3502_v33 = vld [vmem:[#allocation5 + $0x270] ss:$8 sps:$4 sm:$0xff]  }
 0x182   :  { %1925 = vmatprep.subr.bf16.mxu0 %v3468_v34  ;;  %v3507_v34 = vld [vmem:[#allocation5 + $0x284] ss:$8 sps:$4 sm:$0xff]  }
 0x185   :  { %1926 = vmatpush1.bf16.msra.mxu0 %v3466_v35  ;;  %v3598_v35 = vld [vmem:[#allocation7 + $0xe0] ss:$16 sps:$4 sm:$0xff]  }
 0x186   :  { %1927 = vmatprep.subr.bf16.mxu0 %v3471_v36  ;;  %v3603_v36 = vld [vmem:[#allocation7 + $0x104] ss:$16 sps:$4 sm:$0xff]   ;;  %2447 = vmatpush1.bf16.msra.mxu1 %v3598_v35  ;;  %v3550_v35 = vld [vmem:[#allocation5 + $0x370] ss:$8 sps:$4 sm:$0xff]  }
 0x187   :  { %2448 = vmatprep.subr.bf16.mxu1 %v3603_v36  ;;  %v3555_v36 = vld [vmem:[#allocation5 + $0x384] ss:$8 sps:$4 sm:$0xff]  }
 0x189   :  { %1928 = vmatpush1.bf16.msra.mxu0 %v3469_v37  ;;  %v3505_v37 = vld [vmem:[#allocation5 + $0x280] ss:$8 sps:$4 sm:$0xff]  }
 0x18a   :  { %1929 = vmatprep.subr.bf16.mxu0 %v3474_v39  ;;  %v3510_v39 = vld [vmem:[#allocation5 + $0x294] ss:$8 sps:$4 sm:$0xff]   ;;  %2449 = vmatpush1.bf16.msra.mxu1 %v3601_v40  ;;  %v3556_v40 = vld [vmem:[#allocation5 + $0x390] ss:$8 sps:$4 sm:$0xff]  }
 0x18d   :  { %1930 = vmatpush1.bf16.msra.mxu0 %v3472_v41  ;;  %v3606_v41 = vld [vmem:[#allocation7 + $0x124] ss:$16 sps:$4 sm:$0xff]  }
 0x18e   :  { %1931 = vmatprep.subr.bf16.mxu0 %v3477_v43  ;;  %v3513_v43 = vld [vmem:[#allocation5 + $0x2a4] ss:$8 sps:$4 sm:$0xff]   ;;  %2450 = vmatprep.subr.bf16.mxu1 %v3606_v41 }
 0x18f   :  { %v3955_v48 = vpop.f32.mrb[4].mxu0  ;;  %2451 = vmatpush1.bf16.msra.mxu1 %v3604_v44  ;;  %v3561_v41 = vld [vmem:[#allocation5 + $0x3a4] ss:$8 sps:$4 sm:$0xff]   ;;  %v3562_v44 = vld [vmem:[#allocation5 + $0x3b0] ss:$8 sps:$4 sm:$0xff]  }
 0x190   :  { %v1032_v50 = vpop.f32.mrb[5].mxu0  ;;  %v3957_v5 = vpop.f32.mrb[4].mxu1 }
 0x191   :  { %1932 = vmatpush1.bf16.msra.mxu0 %v3475_v45  ;;  %v1033_v55 = vadd.f32 %v1032_v50, %v232_v46  ;;  %v1034_v56 = vpop.f32.mrb[6].mxu0  ;;  %v3959_v6 = vpop.f32.mrb[5].mxu1  ;;  %v3609_v45 = vld [vmem:[#allocation7 + $0x144] ss:$16 sps:$4 sm:$0xff]   ;;  %v3511_v46 = vld [vmem:[#allocation5 + $0x2a0] ss:$8 sps:$4 sm:$0xff]  }
 0x192   :  { %1933 = vmatprep.subr.bf16.mxu0 %v3480_v47  ;;  %v1035_v58 = vpop.f32.mrb[7].mxu0  ;;  %v1075_v8 = vpop.f32.mrb[6].mxu1  ;;  %v3516_v47 = vld [vmem:[#allocation5 + $0x2b4] ss:$8 sps:$4 sm:$0xff]   ;;  %2452 = vmatprep.subr.bf16.mxu1 %v3609_v45  ;;  %v3610_v56 = vld [vmem:[#allocation7 + $0x160] ss:$16 sps:$4 sm:$0xff]  }
 0x193   :  { %v1083_v59 = vmax.f32 %v1033_v55, 0.0  ;;  %v1076_v12 = vpop.f32.mrb[7].mxu1  ;;  %v3612_v50 = vld [vmem:[#allocation7 + $0x164] ss:$16 sps:$4 sm:$0xff]   ;;  %2453 = vmatpush1.bf16.msra.mxu1 %v3607_v49 }
 0x194   :  { %v3519_v55 = vld [vmem:[#allocation5 + $0x2c4] ss:$8 sps:$4 sm:$0xff]   ;;  %2454 = vmatprep.subr.bf16.mxu1 %v3612_v50  ;;  %v3528_v12 = vld [vmem:[#allocation5 + $0x2f4] ss:$8 sps:$4 sm:$0xff]   ;;  %v3568_v50 = vld [vmem:[#allocation5 + $0x3d0] ss:$8 sps:$4 sm:$0xff]  }
 0x195   :  { %1934 = vmatpush1.bf16.msra.mxu0 %v3478_v51  ;;  %v1091_v61 = vpack.c.bf16 %v1083_v59, %v1083_v59  ;;  %v3514_v51 = vld [vmem:[#allocation5 + $0x2b0] ss:$8 sps:$4 sm:$0xff]   ;;  %v3615_v58 = vld [vmem:[#allocation7 + $0x184] ss:$16 sps:$4 sm:$0xff]   ;;  %v3517_v59 = vld [vmem:[#allocation5 + $0x2c0] ss:$8 sps:$4 sm:$0xff]  }
 0x196   :  { %1944 = vmatprep.subr.bf16.mxu0 %v3483_v57  ;;  %v227_v57 = vsub.s32 4, %v3905_v16  ;;  %v3621_v8 = vld [vmem:[#allocation7 + $0x1c4] ss:$16 sps:$4 sm:$0xff]  }
 0x197   :  { %2455 = vmatpush1.bf16.msra.mxu1 %v3610_v56  ;;  %v3567_v45 = vld [vmem:[#allocation5 + $0x3c4] ss:$8 sps:$4 sm:$0xff]   ;;  %v3570_v49 = vld [vmem:[#allocation5 + $0x3d4] ss:$8 sps:$4 sm:$0xff]   ;;  %v3571_v56 = vld [vmem:[#allocation5 + $0x3e0] ss:$8 sps:$4 sm:$0xff]  }
 0x198   :  { %1936 = vmatmul.mubr.bf16.vlgmr.msra.gmra.mrb[8].mxu0 %v1088_v60  ;;  %v239_v60 = vsub.s32 7, %v3905_v16  ;;  %2456 = vmatprep.subr.bf16.mxu1 %v3615_v58  ;;  %v3576_v58 = vld [vmem:[#allocation5 + $0x3f4] ss:$8 sps:$4 sm:$0xff]  }
 0x199   :  { %1945 = vmatpush1.bf16.msra.mxu0 %v3481_v38  ;;  %1976 = vmatprep.mubr.bf16.mxu0 %v1091_v61  ;;  %v3522_v38 = vld [vmem:[#allocation5 + $0x2d4] ss:$8 sps:$4 sm:$0xff]   ;;  %v3613_v61 = vld [vmem:[#allocation7 + $0x180] ss:$16 sps:$4 sm:$0xff]  }
 0x19a   :  { %1946 = vmatprep.subr.bf16.mxu0 %v3486_v62  ;;  %v228_v62 = vrot.slane %v3936_v53, %v227_v57 }
 0x19b   :  { %2457 = vmatpush1.bf16.msra.mxu1 %v3613_v61  ;;  %v3627_v61 = vld [vmem:[#allocation7 + $0xc] ss:$16 sps:$4 sm:$0xff]  }
 0x19c   :  { %v1031_v7 = vadd.f32 %v3955_v48, %v228_v62  ;;  %2458 = vmatprep.subr.bf16.mxu1 %v3618_v63  ;;  %v3622_v48 = vld [vmem:[#allocation7 + $0x1e0] ss:$16 sps:$4 sm:$0xff]  }
 0x19d   :  { %1947 = vmatpush1.bf16.msra.mxu0 %v3484_v2  ;;  %v240_v2 = vrot.slane %v3936_v53, %v239_v60 }
 0x19e   :  { %1948 = vmatprep.subr.bf16.mxu0 %v3489_v4  ;;  %v3616_v4 = vld [vmem:[#allocation7 + $0x1a0] ss:$16 sps:$4 sm:$0xff]   ;;  %v1082_v14 = vmax.f32 %v1031_v7, 0.0  ;;  %v3631_v7 = vld [vmem:[#allocation7 + $0x48] ss:$16 sps:$4 sm:$0xff]  }
 0x19f   :  { %2459 = vmatpush1.bf16.msra.mxu1 %v3616_v4  ;;  %v3633_v4 = vld [vmem:[#allocation7 + $0x4c] ss:$16 sps:$4 sm:$0xff]  }
 0x1a0   :  { %2460 = vmatprep.subr.bf16.mxu1 %v3621_v8  ;;  %v1090_v20 = vpack.c.bf16 %v1082_v14, %v1082_v14  ;;  %v3636_v8 = vld [vmem:[#allocation7 + $0x6c] ss:$16 sps:$4 sm:$0xff]   ;;  %v3640_v14 = vld [vmem:[#allocation7 + $0xa8] ss:$16 sps:$4 sm:$0xff]  }
 0x1a1   :  { %1949 = vmatpush1.bf16.msra.mxu0 %v3487_v10  ;;  %v1074_v10 = vadd.f32 %v3959_v6, %v240_v2  ;;  %v3534_v6 = vld [vmem:[#allocation5 + $0x314] ss:$8 sps:$4 sm:$0xff]  }
 0x1a2   :  { %1950 = vmatprep.subr.bf16.mxu0 %v3492_v13  ;;  %v3619_v13 = vld [vmem:[#allocation7 + $0x1c0] ss:$16 sps:$4 sm:$0xff]  }
 0x1a3   :  { %2461 = vmatpush1.bf16.msra.mxu1 %v3619_v13  ;;  %v3642_v13 = vld [vmem:[#allocation7 + $0xac] ss:$16 sps:$4 sm:$0xff]  }
 0x1a4   :  { %2462 = vmatprep.subr.bf16.mxu1 %v3624_v15  ;;  %v3645_v15 = vld [vmem:[#allocation7 + $0xcc] ss:$16 sps:$4 sm:$0xff]  }
 0x1a5   :  { %1951 = vmatpush1.bf16.msra.mxu0 %v3490_v17  ;;  %v3526_v17 = vld [vmem:[#allocation5 + $0x2f0] ss:$8 sps:$4 sm:$0xff]  }
 0x1a6   :  { %1952 = vmatprep.subr.bf16.mxu0 %v3495_v18  ;;  %v1085_v18 = vmax.f32 %v1074_v10, 0.0  ;;  %v3639_v10 = vld [vmem:[#allocation7 + $0x8c] ss:$16 sps:$4 sm:$0xff]  }
 0x1a7   :  { %2463 = vmatpush1.bf16.msra.mxu1 %v3622_v48  ;;  %v3651_v48 = vld [vmem:[#allocation7 + $0x10c] ss:$16 sps:$4 sm:$0xff]  }
 0x1a8   :  { %2471 = vmatprep.subr.bf16.mxu1 %v3627_v61 }
 0x1a9   :  { %1953 = vmatpush1.bf16.msra.mxu0 %v3493_v21  ;;  %v3529_v21 = vld [vmem:[#allocation5 + $0x300] ss:$8 sps:$4 sm:$0xff]  }
 0x1aa   :  { %1954 = vmatprep.subr.bf16.mxu0 %v3498_v22  ;;  %v1093_v22 = vpack.c.bf16 %v1085_v18, %v1085_v18  ;;  %v3648_v18 = vld [vmem:[#allocation7 + $0xec] ss:$16 sps:$4 sm:$0xff]  }
 0x1ad   :  { %1955 = vmatpush1.bf16.msra.mxu0 %v3496_v25  ;;  %v3535_v25 = vld [vmem:[#allocation5 + $0x320] ss:$8 sps:$4 sm:$0xff]  }
 0x1ae   :  { %1956 = vmatprep.subr.bf16.mxu0 %v3501_v26  ;;  %v3540_v26 = vld [vmem:[#allocation5 + $0x334] ss:$8 sps:$4 sm:$0xff]  }
 0x1b1   :  { %1957 = vmatpush1.bf16.msra.mxu0 %v3499_v29  ;;  %v3541_v29 = vld [vmem:[#allocation5 + $0x340] ss:$8 sps:$4 sm:$0xff]  }
 0x1b2   :  { %1958 = vmatprep.subr.bf16.mxu0 %v3504_v30  ;;  %v3546_v30 = vld [vmem:[#allocation5 + $0x354] ss:$8 sps:$4 sm:$0xff]  }
 0x1b5   :  { %1959 = vmatpush1.bf16.msra.mxu0 %v3502_v33  ;;  %v3547_v33 = vld [vmem:[#allocation5 + $0x360] ss:$8 sps:$4 sm:$0xff]  }
 0x1b6   :  { %1960 = vmatprep.subr.bf16.mxu0 %v3507_v34  ;;  %v3552_v34 = vld [vmem:[#allocation5 + $0x374] ss:$8 sps:$4 sm:$0xff]  }
 0x1b9   :  { %1961 = vmatpush1.bf16.msra.mxu0 %v3505_v37  ;;  %v3553_v37 = vld [vmem:[#allocation5 + $0x380] ss:$8 sps:$4 sm:$0xff]  }
 0x1ba   :  { %1962 = vmatprep.subr.bf16.mxu0 %v3510_v39  ;;  %v3558_v39 = vld [vmem:[#allocation5 + $0x394] ss:$8 sps:$4 sm:$0xff]  }
 0x1bd   :  { %1963 = vmatpush1.bf16.msra.mxu0 %v3508_v42  ;;  %v3559_v42 = vld [vmem:[#allocation5 + $0x3a0] ss:$8 sps:$4 sm:$0xff]  }
 0x1be   :  { %1964 = vmatprep.subr.bf16.mxu0 %v3513_v43  ;;  %v3564_v43 = vld [vmem:[#allocation5 + $0x3b4] ss:$8 sps:$4 sm:$0xff]  }
 0x1c1   :  { %1965 = vmatpush1.bf16.msra.mxu0 %v3511_v46  ;;  %v3565_v46 = vld [vmem:[#allocation5 + $0x3c0] ss:$8 sps:$4 sm:$0xff]  }
 0x1c2   :  { %1966 = vmatprep.subr.bf16.mxu0 %v3516_v47  ;;  %v235_v47 = vsub.s32 6, %v3905_v16  ;;  %v3706_v16 = vld [vmem:[%s4113_s8 + $0x8] sm:$0xff]  }
 0x1c5   :  { %1967 = vmatpush1.bf16.msra.mxu0 %v3514_v51  ;;  %v236_v51 = vrot.slane %v3936_v53, %v235_v47  ;;  %v3625_v53 = vld [vmem:[#allocation7 + $0x8] ss:$16 sps:$4 sm:$0xff]   ;;  %v3685_v47 = vld [vmem:[%s4111_s6 + $0x70] sm:$0xff]  }
 0x1c6   :  { %1968 = vmatprep.subr.bf16.mxu0 %v3519_v55  ;;  %v3573_v55 = vld [vmem:[#allocation5 + $0x3e4] ss:$8 sps:$4 sm:$0xff]  }
 0x1c7   :  { %v1072_v57 = vadd.f32 %v3957_v5, %v236_v51  ;;  %v3628_v5 = vld [vmem:[#allocation7 + $0x28] ss:$16 sps:$4 sm:$0xff]  }
 0x1c8   :  { %v3688_v51 = vld [vmem:[%s4111_s6 + $0x38] sm:$0xff]  }
 0x1c9   :  { %1969 = vmatpush1.bf16.msra.mxu0 %v3517_v59  ;;  %v3574_v59 = vld [vmem:[#allocation5 + $0x3f0] ss:$8 sps:$4 sm:$0xff]   ;;  %v1084_v60 = vmax.f32 %v1072_v57, 0.0 }
 0x1ca   :  { %1970 = vmatprep.subr.bf16.mxu0 %v3522_v38 }
 0x1cb   :  { %v1092_v38 = vpack.c.bf16 %v1084_v60, %v1084_v60 }
 0x1cd   :  { %1971 = vmatpush1.bf16.msra.mxu0 %v3520_v1  ;;  %v3630_v1 = vld [vmem:[#allocation7 + $0x2c] ss:$16 sps:$4 sm:$0xff]  }
 0x1ce   :  { %1972 = vmatprep.subr.bf16.mxu0 %v3525_v3 }
 0x1d1   :  { %1973 = vmatpush1.bf16.msra.mxu0 %v3523_v9  ;;  %v3634_v9 = vld [vmem:[#allocation7 + $0x68] ss:$16 sps:$4 sm:$0xff]  }
 0x1d2   :  { %1974 = vmatprep.subr.bf16.mxu0 %v3528_v12  ;;  %v3637_v12 = vld [vmem:[#allocation7 + $0x88] ss:$16 sps:$4 sm:$0xff]  }
 0x1d5   :  { %1975 = vmatpush1.bf16.msra.mxu0 %v3526_v17  ;;  %v3643_v17 = vld [vmem:[#allocation7 + $0xc8] ss:$16 sps:$4 sm:$0xff]  }
 0x1d6   :  { %1985 = vmatprep.subr.bf16.mxu0 %v3531_v19  ;;  %v3646_v19 = vld [vmem:[#allocation7 + $0xe8] ss:$16 sps:$4 sm:$0xff]  }
 0x1d8   :  { %1977 = vmatmul.mubr.bf16.vlgmr.msra.gmra.mrb[8].mxu0 %v1090_v20  ;;  %v3649_v20 = vld [vmem:[#allocation7 + $0x108] ss:$16 sps:$4 sm:$0xff]  }
 0x1d9   :  { %1986 = vmatpush1.bf16.msra.mxu0 %v3529_v21  ;;  %2017 = vmatprep.mubr.bf16.mxu0 %v1093_v22  ;;  %v3654_v21 = vld [vmem:[#allocation7 + $0x12c] ss:$16 sps:$4 sm:$0xff]   ;;  %v3652_v22 = vld [vmem:[#allocation7 + $0x128] ss:$16 sps:$4 sm:$0xff]  }
 0x1da   :  { %1987 = vmatprep.subr.bf16.mxu0 %v3534_v6  ;;  %v3657_v6 = vld [vmem:[#allocation7 + $0x14c] ss:$16 sps:$4 sm:$0xff]  }
 0x1dd   :  { %1988 = vmatpush1.bf16.msra.mxu0 %v3532_v24  ;;  %v3655_v24 = vld [vmem:[#allocation7 + $0x148] ss:$16 sps:$4 sm:$0xff]  }
 0x1de   :  { %1989 = vmatprep.subr.bf16.mxu0 %v3537_v23  ;;  %v3660_v23 = vld [vmem:[#allocation7 + $0x16c] ss:$16 sps:$4 sm:$0xff]  }
 0x1e1   :  { %1990 = vmatpush1.bf16.msra.mxu0 %v3535_v25  ;;  %v3658_v25 = vld [vmem:[#allocation7 + $0x168] ss:$16 sps:$4 sm:$0xff]  }
 0x1e2   :  { %1991 = vmatprep.subr.bf16.mxu0 %v3540_v26  ;;  %v3663_v26 = vld [vmem:[#allocation7 + $0x18c] ss:$16 sps:$4 sm:$0xff]  }
 0x1e5   :  { %1992 = vmatpush1.bf16.msra.mxu0 %v3538_v27  ;;  %v3661_v27 = vld [vmem:[#allocation7 + $0x188] ss:$16 sps:$4 sm:$0xff]  }
 0x1e6   :  { %1993 = vmatprep.subr.bf16.mxu0 %v3543_v28  ;;  %v3666_v28 = vld [vmem:[#allocation7 + $0x1ac] ss:$16 sps:$4 sm:$0xff]  }
 0x1e9   :  { %1994 = vmatpush1.bf16.msra.mxu0 %v3541_v29  ;;  %v3664_v29 = vld [vmem:[#allocation7 + $0x1a8] ss:$16 sps:$4 sm:$0xff]  }
 0x1ea   :  { %1995 = vmatprep.subr.bf16.mxu0 %v3546_v30  ;;  %v3669_v30 = vld [vmem:[#allocation7 + $0x1cc] ss:$16 sps:$4 sm:$0xff]  }
 0x1ed   :  { %1996 = vmatpush1.bf16.msra.mxu0 %v3544_v31  ;;  %v3667_v31 = vld [vmem:[#allocation7 + $0x1c8] ss:$16 sps:$4 sm:$0xff]  }
 0x1ee   :  { %1997 = vmatprep.subr.bf16.mxu0 %v3549_v32  ;;  %v3672_v32 = vld [vmem:[#allocation7 + $0x1ec] ss:$16 sps:$4 sm:$0xff]  }
 0x1f1   :  { %1998 = vmatpush1.bf16.msra.mxu0 %v3547_v33  ;;  %v3670_v33 = vld [vmem:[#allocation7 + $0x1e8] ss:$16 sps:$4 sm:$0xff]  }
 0x1f2   :  { %1999 = vmatprep.subr.bf16.mxu0 %v3552_v34  ;;  %v3673_v34 = vld [vmem:[%s4111_s6 + $0x40] sm:$0xff]  }
 0x1f5   :  { %2000 = vmatpush1.bf16.msra.mxu0 %v3550_v35  ;;  %v3674_v35 = vld [vmem:[%s4111_s6] sm:$0xff]  }
 0x1f6   :  { %2001 = vmatprep.subr.bf16.mxu0 %v3555_v36  ;;  %v3675_v36 = vld [vmem:[%s4111_s6 + $0x48] sm:$0xff]  }
 0x1f9   :  { %2002 = vmatpush1.bf16.msra.mxu0 %v3553_v37  ;;  %v3676_v37 = vld [vmem:[%s4111_s6 + $0x8] sm:$0xff]  }
 0x1fa   :  { %2003 = vmatprep.subr.bf16.mxu0 %v3558_v39  ;;  %v3677_v39 = vld [vmem:[%s4111_s6 + $0x50] sm:$0xff]  }
 0x1fd   :  { %2004 = vmatpush1.bf16.msra.mxu0 %v3556_v40  ;;  %v3678_v40 = vld [vmem:[%s4111_s6 + $0x10] sm:$0xff]  }
 0x1fe   :  { %2005 = vmatprep.subr.bf16.mxu0 %v3561_v41  ;;  %v3679_v41 = vld [vmem:[%s4111_s6 + $0x58] sm:$0xff]  }
 0x201   :  { %2006 = vmatpush1.bf16.msra.mxu0 %v3559_v42  ;;  %v3680_v42 = vld [vmem:[%s4111_s6 + $0x18] sm:$0xff]  }
 0x202   :  { %2007 = vmatprep.subr.bf16.mxu0 %v3564_v43  ;;  %v3681_v43 = vld [vmem:[%s4111_s6 + $0x60] sm:$0xff]  }
 0x205   :  { %2008 = vmatpush1.bf16.msra.mxu0 %v3562_v44  ;;  %v3682_v44 = vld [vmem:[%s4111_s6 + $0x20] sm:$0xff]  }
 0x206   :  { %2009 = vmatprep.subr.bf16.mxu0 %v3567_v45  ;;  %v3683_v45 = vld [vmem:[%s4111_s6 + $0x68] sm:$0xff]  }
 0x209   :  { %2010 = vmatpush1.bf16.msra.mxu0 %v3565_v46  ;;  %v3684_v46 = vld [vmem:[%s4111_s6 + $0x28] sm:$0xff]  }
 0x20a   :  { %2011 = vmatprep.subr.bf16.mxu0 %v3570_v49  ;;  %v3686_v49 = vld [vmem:[%s4111_s6 + $0x30] sm:$0xff]  }
 0x20d   :  { %2012 = vmatpush1.bf16.msra.mxu0 %v3568_v50  ;;  %v3687_v50 = vld [vmem:[%s4111_s6 + $0x78] sm:$0xff]  }
 0x20e   :  { %2013 = vmatprep.subr.bf16.mxu0 %v3573_v55  ;;  %v3689_v55 = vld [vmem:[%s4111_s6 + $0xc0] sm:$0xff]  }
 0x211   :  { %2014 = vmatpush1.bf16.msra.mxu0 %v3571_v56  ;;  %v2090_v56 = vld [vmem:[%s4110_s5] sm:$0xf] }
 0x212   :  { %2015 = vmatprep.subr.bf16.mxu0 %v3576_v58  ;;  %v2095_v57 = vrot.slane %v2090_v56, %v211_v52  ;;  %v2099_v58 = vrot.slane %v2090_v56, %v215_v54  ;;  %v3692_v52 = vld [vmem:[%s4111_s6 + $0x88] sm:$0xff]   ;;  %v3693_v54 = vld [vmem:[%s4111_s6 + $0xd0] sm:$0xff]  }
 0x215   :  { %2016 = vmatpush1.bf16.msra.mxu0 %v3574_v59 }
 0x218   :  { %2018 = vmatmul.mubr.bf16.vlgmr.msra.gmra.mrb[8].mxu0 %v1092_v38 }
 0x2eb   :  { %v3970_v62 = vpop.f32.mrb[8].mxu0 }
 0x2ec   :  { %v2021_v63 = vpop.f32.mrb[9].mxu0 }
 0x2ed   :  { %v2023_v2 = vpop.f32.mrb[10].mxu0  ;;  %2464 = vmatprep.mubr.f32.mxu1 %v2021_v63 }
 0x2ee   :  { %v2024_v3 = vpop.f32.mrb[11].mxu0  ;;  %2465 = vmatmul.mubr.f32.vlgmr.msra.gmra.mrb[8].mxu1 %v3970_v62 }
 0x2ef   :  { %2472 = vmatpush1.bf16.msra.mxu1 %v3625_v53  ;;  %2503 = vmatprep.mubr.f32.mxu1 %v2021_v63  ;;  %v3691_v3 = vld [vmem:[%s4111_s6 + $0xc8] sm:$0xff]  }
 0x2f0   :  { %2473 = vmatprep.subr.bf16.mxu1 %v3630_v1  ;;  %v3690_v1 = vld [vmem:[%s4111_s6 + $0x80] sm:$0xff]  }
 0x2f3   :  { %2474 = vmatpush1.bf16.msra.mxu1 %v3628_v5  ;;  %v3694_v5 = vld [vmem:[%s4111_s6 + $0x90] sm:$0xff]  }
 0x2f4   :  { %2475 = vmatprep.subr.bf16.mxu1 %v3633_v4  ;;  %v3695_v4 = vld [vmem:[%s4111_s6 + $0xd8] sm:$0xff]  }
 0x2f7   :  { %2476 = vmatpush1.bf16.msra.mxu1 %v3631_v7  ;;  %v3696_v7 = vld [vmem:[%s4111_s6 + $0x98] sm:$0xff]  }
 0x2f8   :  { %2477 = vmatprep.subr.bf16.mxu1 %v3636_v8  ;;  %v3697_v8 = vld [vmem:[%s4111_s6 + $0xe0] sm:$0xff]  }
 0x2fb   :  { %2478 = vmatpush1.bf16.msra.mxu1 %v3634_v9  ;;  %v3698_v9 = vld [vmem:[%s4111_s6 + $0xa0] sm:$0xff]  }
 0x2fc   :  { %2479 = vmatprep.subr.bf16.mxu1 %v3639_v10  ;;  %v3699_v10 = vld [vmem:[%s4111_s6 + $0xe8] sm:$0xff]  }
 0x2ff   :  { %2480 = vmatpush1.bf16.msra.mxu1 %v3637_v12  ;;  %v3700_v12 = vld [vmem:[%s4111_s6 + $0xa8] sm:$0xff]  }
 0x300   :  { %2481 = vmatprep.subr.bf16.mxu1 %v3642_v13  ;;  %v3701_v13 = vld [vmem:[%s4111_s6 + $0xf0] sm:$0xff]  }
 0x303   :  { %2482 = vmatpush1.bf16.msra.mxu1 %v3640_v14  ;;  %v3702_v14 = vld [vmem:[%s4111_s6 + $0xb0] sm:$0xff]  }
 0x304   :  { %2483 = vmatprep.subr.bf16.mxu1 %v3645_v15  ;;  %v3703_v15 = vld [vmem:[%s4111_s6 + $0xf8] sm:$0xff]  }
 0x307   :  { %2484 = vmatpush1.bf16.msra.mxu1 %v3643_v17  ;;  %v3704_v17 = vld [vmem:[%s4111_s6 + $0xb8] sm:$0xff]  }
 0x308   :  { %2485 = vmatprep.subr.bf16.mxu1 %v3648_v18  ;;  %v2103_v18 = vrot.slane %v2090_v56, %v219_v11 }
 0x30b   :  { %2486 = vmatpush1.bf16.msra.mxu1 %v3646_v19  ;;  %v2107_v19 = vrot.slane %v2090_v56, %v223_v0 }
 0x30c   :  { %2487 = vmatprep.subr.bf16.mxu1 %v3651_v48 }
 0x30f   :  { %2488 = vmatpush1.bf16.msra.mxu1 %v3649_v20 }
 0x310   :  { %2489 = vmatprep.subr.bf16.mxu1 %v3654_v21 }
 0x313   :  { %2490 = vmatpush1.bf16.msra.mxu1 %v3652_v22 }
 0x314   :  { %2491 = vmatprep.subr.bf16.mxu1 %v3657_v6 }
 0x317   :  { %2492 = vmatpush1.bf16.msra.mxu1 %v3655_v24 }
 0x318   :  { %2493 = vmatprep.subr.bf16.mxu1 %v3660_v23 }
 0x31b   :  { %2494 = vmatpush1.bf16.msra.mxu1 %v3658_v25 }
 0x31c   :  { %2495 = vmatprep.subr.bf16.mxu1 %v3663_v26  ;;  %v3705_v26 = vld [vmem:[%s4113_s8] sm:$0xff]  }
 0x31f   :  { %2496 = vmatpush1.bf16.msra.mxu1 %v3661_v27  ;;  %v3811_v27 = vmov 0.0  }
 0x320   :  { %2497 = vmatprep.subr.bf16.mxu1 %v3666_v28 }
 0x323   :  { %2498 = vmatpush1.bf16.msra.mxu1 %v3664_v29 }
 0x324   :  { %2499 = vmatprep.subr.bf16.mxu1 %v3669_v30 }
 0x327   :  { %2500 = vmatpush1.bf16.msra.mxu1 %v3667_v31  ;;  %v3268_v31 = vld [vmem:[%s4112_s7] ss:$0 sm:$0xff]  ;;  %s3773_s7 = scalar_lea.vmem %s2938_s4, 32 }
 0x328   :  { %2501 = vmatprep.subr.bf16.mxu1 %v3672_v32  ;;  %p3774_p10 = scmp.ne.s32.totalorder %s2938_s4, %s3773_s7  ;;  %p3779_p12 = scmp.lt.s32.totalorder %s3773_s7, %s3773_s7 }
 0x32a   :  { %p3780_p13 = por %p3779_p12, %p3778_p11 }
 0x32b   :  { %2502 = vmatpush1.bf16.msra.mxu1 %v3670_v33 }
 0x32c   :  { %3305 = vmatprep.subr.bf16.mxu1 %v3673_v34  ;;  %p3781_p0 = pnand %p3780_p13, %p3774_p10 }
 0x32e   :  { %2504 = vmatmul.mubr.f32.vlgmr.msra.gmra.mrb[10].mxu1 %v3970_v62 }
 0x32f   :  { %3306 = vmatpush3.bf16.msra.mxu1 %v3674_v35 }
 0x330   :  { %3307 = vmatprep.subr.bf16.mxu1 %v3675_v36 }
 0x333   :  { %3308 = vmatpush3.bf16.msra.mxu1 %v3676_v37 }
 0x334   :  { %3309 = vmatprep.subr.bf16.mxu1 %v3677_v39 }
 0x337   :  { %3310 = vmatpush3.bf16.msra.mxu1 %v3678_v40 }
 0x338   :  { %3311 = vmatprep.subr.bf16.mxu1 %v3679_v41 }
 0x33b   :  { %3312 = vmatpush3.bf16.msra.mxu1 %v3680_v42  ;;  %v3301_v42 = vld [vmem:[%s4114_s9] ss:$0 sm:$0xff] }
 0x33c   :  { %3313 = vmatprep.subr.bf16.mxu1 %v3681_v43 }
 0x33f   :  { %3314 = vmatpush3.bf16.msra.mxu1 %v3682_v44 }
 0x340   :  { %3315 = vmatprep.subr.bf16.mxu1 %v3683_v45 }
 0x343   :  { %3316 = vmatpush3.bf16.msra.mxu1 %v3684_v46 }
 0x344   :  { %3317 = vmatprep.subr.bf16.mxu1 %v3685_v47 }
 0x347   :  { %3318 = vmatpush3.bf16.msra.mxu1 %v3686_v49 }
 0x348   :  { %3319 = vmatprep.subr.bf16.mxu1 %v3687_v50 }
 0x34b   :  { %3320 = vmatpush3.bf16.msra.mxu1 %v3688_v51 }
 0x34c   :  { %3327 = vmatprep.subr.bf16.mxu1 %v3689_v55 }
 0x3c1   :  { %v2466_v59 = vpop.f32.mrb[8].mxu1 }
 0x3c2   :  { %v2467_v60 = vadd.f32 %v2466_v59, %v2095_v57  ;;  %v2468_v38 = vpop.f32.mrb[9].mxu1 }
 0x3c3   :  { %v2469_v61 = vadd.f32 %v2468_v38, %v2099_v58 }
 0x3c4   :  { %v2510_v62 = vmax.f32 %v2467_v60, 0.0 }
 0x3c5   :  { %v2511_v53 = vmax.f32 %v2469_v61, 0.0 }
 0x3c6   :  { %v2514_v2 = vpack.c.bf16 %v2510_v62, %v2510_v62 }
 0x3c7   :  { %v2515_v63 = vpack.c.bf16 %v2511_v53, %v2511_v53 }
 0x3c9   :  { %2813 = vmatprep.mubr.bf16.mxu1 %v2515_v63 }
 0x3ca   :  { %2814 = vmatmul.mubr.bf16.vlgmr.msra.gmra.mrb[12].mxu1 %v2514_v2 }
 0x3cb   :  { %3328 = vmatpush3.bf16.msra.mxu1 %v3690_v1 }
 0x3cc   :  { %3329 = vmatprep.subr.bf16.mxu1 %v3691_v3 }
 0x3cf   :  { %3330 = vmatpush3.bf16.msra.mxu1 %v3692_v52 }
 0x3d0   :  { %3331 = vmatprep.subr.bf16.mxu1 %v3693_v54 }
 0x3d3   :  { %3332 = vmatpush3.bf16.msra.mxu1 %v3694_v5 }
 0x3d4   :  { %3333 = vmatprep.subr.bf16.mxu1 %v3695_v4 }
 0x3d7   :  { %3334 = vmatpush3.bf16.msra.mxu1 %v3696_v7 }
 0x3d8   :  { %3335 = vmatprep.subr.bf16.mxu1 %v3697_v8 }
 0x3db   :  { %3336 = vmatpush3.bf16.msra.mxu1 %v3698_v9 }
 0x3dc   :  { %3337 = vmatprep.subr.bf16.mxu1 %v3699_v10 }
 0x3df   :  { %3338 = vmatpush3.bf16.msra.mxu1 %v3700_v12 }
 0x3e0   :  { %3339 = vmatprep.subr.bf16.mxu1 %v3701_v13 }
 0x3e3   :  { %3340 = vmatpush3.bf16.msra.mxu1 %v3702_v14 }
 0x3e4   :  { %3341 = vmatprep.subr.bf16.mxu1 %v3703_v15 }
 0x3e7   :  { %3342 = vmatpush3.bf16.msra.mxu1 %v3704_v17 }
 0x3e8   :  { %3352 = vmatprep.subr.bf16.mxu1 %v3811_v27 }
 0x401   :  { %v2505_v48 = vpop.f32.mrb[10].mxu1 }
 0x402   :  { %v2506_v20 = vadd.f32 %v2505_v48, %v2103_v18  ;;  %v2507_v21 = vpop.f32.mrb[11].mxu1 }
 0x403   :  { %v2508_v22 = vadd.f32 %v2507_v21, %v2107_v19 }
 0x404   :  { %v2512_v6 = vmax.f32 %v2506_v20, 0.0 }
 0x405   :  { %v2513_v24 = vmax.f32 %v2508_v22, 0.0 }
 0x406   :  { %v2516_v25 = vpack.c.bf16 %v2512_v6, %v2512_v6 }
 0x407   :  { %v2517_v23 = vpack.c.bf16 %v2513_v24, %v2513_v24 }
 0x409   :  { %2853 = vmatprep.mubr.bf16.mxu1 %v2517_v23 }
 0x40a   :  { %2854 = vmatmul.mubr.bf16.vlgmr.msra.gmra.mrb[16].mxu1 %v2516_v25 }
 0x40b   :  { %3353 = vmatpush3.bf16.msra.mxu1 %v3705_v26  ;;  %3356 = vmatprep.mubr.msk.bf16.mxu1 %vm3812_vm0, %v3811_v27 }
 0x40c   :  { %3354 = vmatprep.subr.bf16.mxu1 %v3811_v27 }
 0x40f   :  { %3355 = vmatpush3.bf16.msra.mxu1 %v3706_v16 }
 0x49d   :  { %v3321_v0 = vpop.f32.mrb[12].mxu1 }
 0x49e   :  { %v3322_v11 = vpop.f32.mrb[13].mxu1 }
 0x49f   :  { %v3323_v28 = vadd.f32 %v3322_v11, %v3321_v0  ;;  %v3324_v29 = vpop.f32.mrb[14].mxu1 }
 0x4a0   :  { %v3325_v30 = vpop.f32.mrb[15].mxu1 }
 0x4a1   :  { %v2816_v34 = vadd.f32 %v3323_v28, %v3268_v31 }
 0x4dd   :  { %v3343_v32 = vpop.f32.mrb[16].mxu1 }
 0x4de   :  { %v3344_v33 = vpop.f32.mrb[17].mxu1 }
 0x4df   :  { %v3345_v35 = vadd.f32 %v3344_v33, %v3343_v32  ;;  %v3346_v36 = vpop.f32.mrb[18].mxu1 }
 0x4e0   :  { %v3347_v37 = vpop.f32.mrb[19].mxu1 }
 0x4e1   :  { %v2856_v39 = vadd.f32 %v3345_v35, %v2816_v34 }
 0x4e3   :  { %v2861_v40 = vmax.f32 %v2856_v39, 0.0 }
 0x4e5   :  { %v2862_v41 = vpack.c.bf16 %v2861_v40, %v2861_v40 }
 0x4e7   :  { %3357 = vmatmul.mubr.msk.bf16.vlgmr.msra.gmra.mrb[20].mxu1 %vm2886_vm1, %v2862_v41 }
 0x5ba   :  { %v2924_v43 = vpop.f32.mrb[20].mxu1 }
 0x5bb   :  { %v2925_v44 = vadd.f32 %v3301_v42, %v2924_v43  ;;  %v3358_v45 = vpop.f32.mrb[21].mxu1 }
 0x5bc   :  { %v2927_v46 = vpop.f32.mrb[22].mxu1 }
 0x5bd   :  { %2930 = vst [vmem:[#allocation8] sm:$0x3] %v2925_v44  ;;  %v3359_v47 = vpop.f32.mrb[23].mxu1 }
 0x5be   :  { %3784 = shalt.err (!%p3781_p0)
}
 0x5bf   :  { %s3785_s9 = scalar_lea.hbm %s4115_s10, 32 }
 0x5c0   :  { %p3786_p1 = scmp.ne.s32.totalorder %s4115_s10, %s3785_s9  ;;  %p3789_p2 = scmp.lt.u32.totalorder %s3785_s9, %s4115_s10 }
 0x5c2   :  { %p3791_p3 = pnand %p3789_p2, %p3786_p1 }
 0x5c4   :  { %3794 = shalt.err (!%p3791_p3)
}
 0x5c5   :  { %2940 = dma.vmem_to_hbm [thread:$0]  %s2938_s4, 32, %s4115_s10, [#allocation4]  }
 0x5c6   :  { %3799 = dma.done.wait [#allocation4], 32  }
 0x5c7   :  { %3800 = vsyncadd [#allocation4], 4294967264 }
 0x5c8   :  { %2944 = vsyncpa [#allocation3], 1 }
 0x5c9   :  { %2945 = vsyncpa [#allocation6], 1 }
 0x5ca   :  { %2946 = vsyncpa [#allocation4], 1 }

</bundles_post_ra>
